<compile_context>
chip_gen: v5e
topology: v5e:2x2
jax: 0.10.0
libtpu: 0.0.40
codegen_flags: <defaults>
</compile_context>

<pallas_src>
import math

import numpy as np
import jax
import jax.numpy as jnp
from jax.experimental import pallas as pl
from jax.experimental.pallas import tpu as pltpu

# ----------------------------- config (small) --------------------------------
VOCAB = 100
VOCAB_PAD = 128        # lane/MXU aligned one-hot contraction
HIDDEN = 32            # stand-in for bert.config.hidden_size (=768)
FFN = 64
SEQ = 8
IMG_C, IMG_H, IMG_W = 3, 16, 16
CONV_C = 16            # stand-in for resnet.fc.in_features (=2048)
PROJ = 256             # faithful: text_fc / resnet.fc output dim
NUM_LABELS = 3
OUT_PAD = 8            # logits live in lanes [0, 3)
BATCH = 2

VMEM_SPEC = pl.BlockSpec(memory_space=pltpu.MemorySpace.VMEM)


def _layernorm(x, gamma, beta, eps=1e-12):
    mu = jnp.mean(x, axis=-1, keepdims=True)
    var = jnp.mean(jnp.square(x - mu), axis=-1, keepdims=True)
    return (x - mu) * jax.lax.rsqrt(var + eps) * gamma + beta


# ------------------------------- fused kernel --------------------------------
def fused_kernel(ids_ref, mbias_ref, img_ref,
                 embed_ref, w32_ref, wffn2_ref, wconv_ref,
                 wimgfc_ref, wcls_ref, vecs_ref, out_ref):
    f32 = jnp.float32
    bf16 = jnp.bfloat16
    H = HIDDEN

    # ---- packed bias / LN vectors: one vector per row, lane-0 aligned ----
    bq = vecs_ref[0:1, 0:H]
    bk = vecs_ref[1:2, 0:H]
    bv = vecs_ref[2:3, 0:H]
    bo = vecs_ref[3:4, 0:H]
    ln1g = vecs_ref[4:5, 0:H]
    ln1b = vecs_ref[5:6, 0:H]
    ln2g = vecs_ref[6:7, 0:H]
    ln2b = vecs_ref[7:8, 0:H]
    b1 = vecs_ref[8:9, 0:FFN]
    b2 = vecs_ref[9:10, 0:H]
    conv_b = vecs_ref[10:11, 0:IMG_W * CONV_C]   # conv bias tiled over w positions
    tfc_b = vecs_ref[11:12, 0:PROJ]
    ifc_b = vecs_ref[12:13, 0:PROJ]
    cls_b = vecs_ref[13:14, 0:OUT_PAD]

    # ---- text path: embedding gather as one-hot matmul (VMEM-resident table) ----
    ids = ids_ref[...]                                                  # (B*S, 1) i32
    iota = jax.lax.broadcasted_iota(jnp.int32, (BATCH * SEQ, VOCAB_PAD), 1)
    onehot = (iota == ids).astype(bf16)                                 # exact 0/1
    x = jnp.dot(onehot, embed_ref[...], preferred_element_type=f32)     # (B*S, H) f32

    # fused QKV: one (B*S, H) x (H, 3H) bf16 MXU matmul, then static lane slices
    qkv = jnp.dot(x.astype(bf16), w32_ref[:, 0:3 * H],
                  preferred_element_type=f32)                           # (B*S, 3H)
    k = qkv[:, H:2 * H] + bk                                            # (B*S, H)
    v = qkv[:, 2 * H:3 * H] + bv                                        # (B*S, H)

    # CLS rows only for everything downstream of K/V (exactly equivalent)
    x_cls = jnp.concatenate([x[0:1, :], x[SEQ:SEQ + 1, :]], axis=0)     # (B, H)
    q = jnp.concatenate([qkv[0:1, 0:H], qkv[SEQ:SEQ + 1, 0:H]], axis=0) + bq  # (B, H)

    # batched attention over all B*S keys; block-diagonal mask bias hoisted to wrapper
    scale = 1.0 / math.sqrt(HIDDEN)
    sc = jax.lax.dot_general(q, k, (((1,), (1,)), ((), ())),
                             preferred_element_type=f32) * scale + mbias_ref[...]
    m = jnp.max(sc, axis=-1, keepdims=True)
    e = jnp.exp(sc - m)
    p = e * pl.reciprocal(jnp.sum(e, axis=-1, keepdims=True), approx=True)
    ctx = jnp.dot(p, v, preferred_element_type=f32)                     # (B, H)

    attn_out = jnp.dot(ctx.astype(bf16), w32_ref[:, 3 * H:4 * H],
                       preferred_element_type=f32) + bo
    h1 = _layernorm(x_cls + attn_out, ln1g, ln1b)
    ff = jnp.dot(h1.astype(bf16), w32_ref[:, 4 * H + PROJ:4 * H + PROJ + FFN],
                 preferred_element_type=f32) + b1
    # TODO(synk): HF BERT uses the exact erf GELU; tanh approximation used here.
    ff = jax.nn.gelu(ff, approximate=True)
    ff = jnp.dot(ff.astype(bf16), wffn2_ref[...], preferred_element_type=f32) + b2
    text_cls = _layernorm(h1 + ff, ln2g, ln2b)                          # (B, H)
    text_embed = jnp.dot(text_cls.astype(bf16), w32_ref[:, 4 * H:4 * H + PROJ],
                         preferred_element_type=f32) + tfc_b            # (B, 256)

    # ---- image path: 3x3 'SAME' conv as ONE (B*16, 162) x (162, 256) matmul ----
    conv = jnp.dot(img_ref[...].astype(bf16), wconv_ref[...],
                   preferred_element_type=f32)                          # (B*16, W*C)
    conv = jnp.maximum(conv + conv_b, 0.0)                              # bias + ReLU
    s = jnp.concatenate(
        [jnp.sum(conv[b * IMG_H:(b + 1) * IMG_H, :], axis=0, keepdims=True)
         for b in range(BATCH)], axis=0)                                # (B, W*CONV_C)
    # width-pool via an iota-built 0/1 matrix (zero HBM bytes); 1/(H*W) folded into
    # the resnet.fc weight (exact: pool and fc are linear, ReLU happens before pool).
    r = jax.lax.broadcasted_iota(jnp.int32, (IMG_W * CONV_C, CONV_C), 0)
    c = jax.lax.broadcasted_iota(jnp.int32, (IMG_W * CONV_C, CONV_C), 1)
    pool = ((r & (CONV_C - 1)) == c).astype(f32)                        # CONV_C is 2^n
    feat = jnp.dot(s, pool, preferred_element_type=f32)                 # (B, CONV_C)
    img_embed = jnp.dot(feat.astype(bf16), wimgfc_ref[...],
                        preferred_element_type=f32) + ifc_b             # (B, 256)

    # ---- fusion head: cat(text, img) @ Wc == text @ Wc[:256] + img @ Wc[256:] ----
    out_ref[...] = (jnp.dot(text_embed.astype(bf16), wcls_ref[0:PROJ, :],
                            preferred_element_type=f32)
                    + jnp.dot(img_embed.astype(bf16), wcls_ref[PROJ:2 * PROJ, :],
                              preferred_element_type=f32)
                    + cls_b)                                            # (B, 8)


# ------------------------------- wrapper --------------------------------------
def multimodal_forward(packed, input_ids, attention_mask, images):
    B, S = input_ids.shape
    ids2d = input_ids.reshape(B * S, 1).astype(jnp.int32)

    # block-diagonal additive attention-mask bias over all B*S keys (hoisted here)
    key_bias = (1.0 - attention_mask.astype(jnp.float32)) * (-1e9)      # (B, S)
    eye = jnp.eye(B, dtype=jnp.float32)[:, :, None]                     # (B, B, 1)
    mask_bias = (eye * key_bias[None, :, :]
                 + (1.0 - eye) * (-1e9)).reshape(B, B * S)              # (B, B*S)

    # conv operand: NCHW -> padded NHWC, 3 vertical taps stacked along contraction dim
    x_nhwc = jnp.transpose(images, (0, 2, 3, 1))
    xp = jnp.pad(x_nhwc, ((0, 0), (1, 1), (1, 1), (0, 0)))              # (B,H+2,W+2,C)
    taps = jnp.stack([xp[:, i:i + IMG_H] for i in range(3)], axis=2)    # (B,H,3,W+2,C)
    img2d = taps.reshape(B * IMG_H, 3 * (IMG_W + 2) * IMG_C)            # (32, 162)

    out = pl.pallas_call(
        fused_kernel,
        out_shape=jax.ShapeDtypeStruct((B, OUT_PAD), jnp.float32),
        in_specs=[VMEM_SPEC] * 10,
        out_specs=VMEM_SPEC,
    )(ids2d, mask_bias, img2d,
      packed['embed'], packed['w32'], packed['w_ffn2'], packed['w_conv'],
      packed['w_imgfc'], packed['w_cls'], packed['vecs'])
    return out[:, :NUM_LABELS]


# ----------------------------- parameter packing ------------------------------
def _build_conv_band(w_pt):
    """(C_out, C_in, 3, 3) conv weight -> stacked Toeplitz band (3*(W+2)*C_in, W*C_out)."""
    w = np.asarray(w_pt)
    D, C, KH, KW = w.shape
    band = np.zeros((KH * (IMG_W + 2) * C, IMG_W * D), np.float32)
    for i in range(KH):
        base = i * (IMG_W + 2) * C
        for j in range(KW):
            blk = w[:, :, i, j].T                  # (C_in, C_out)
            for wcol in range(IMG_W):
                wp = wcol + j
                band[base + wp * C: base + (wp + 1) * C,
                     wcol * D:(wcol + 1) * D] = blk
    return jnp.asarray(band).astype(jnp.bfloat16)


def pack_params(p):
    """Fold/pack the module parameters into a handful of bf16/f32 lane-dense operands."""
    bf16 = jnp.bfloat16

    # weight slab: [wq | wk | wv | wo | text_fc | ffn w1]  -> (32, 448) bf16
    w32 = jnp.concatenate([p['wq'], p['wk'], p['wv'], p['wo'],
                           p['text_fc_w'], p['w1']], axis=1).astype(bf16)

    embed = (jnp.zeros((VOCAB_PAD, HIDDEN), jnp.float32)
             .at[:VOCAB].set(p['embed']).astype(bf16))        # padded rows never hit

    vecs = np.zeros((16, 256), np.float32)                    # one vector per row
    vecs[0, :HIDDEN] = np.asarray(p['bq'])
    vecs[1, :HIDDEN] = np.asarray(p['bk'])
    vecs[2, :HIDDEN] = np.asarray(p['bv'])
    vecs[3, :HIDDEN] = np.asarray(p['bo'])
    vecs[4, :HIDDEN] = np.asarray(p['ln1_g'])
    vecs[5, :HIDDEN] = np.asarray(p['ln1_b'])
    vecs[6, :HIDDEN] = np.asarray(p['ln2_g'])
    vecs[7, :HIDDEN] = np.asarray(p['ln2_b'])
    vecs[8, :FFN] = np.asarray(p['b1'])
    vecs[9, :HIDDEN] = np.asarray(p['b2'])
    vecs[10, :IMG_W * CONV_C] = np.tile(np.asarray(p['conv_b']), IMG_W)
    vecs[11, :PROJ] = np.asarray(p['text_fc_b'])
    vecs[12, :PROJ] = np.asarray(p['img_fc_b'])
    vecs[13, :NUM_LABELS] = np.asarray(p['cls_b'])

    w_cls = (jnp.zeros((2 * PROJ, OUT_PAD), jnp.float32)
             .at[:, :NUM_LABELS].set(p['cls_w']).astype(bf16))

    return dict(
        embed=embed,
        w32=w32,
        w_ffn2=p['w2'].astype(bf16),
        w_conv=_build_conv_band(p['conv_w_pt']),
        # global-avg-pool scale folded into resnet.fc weight (power of 2: exact in bf16)
        w_imgfc=(p['img_fc_w'] / float(IMG_H * IMG_W)).astype(bf16),
        w_cls=w_cls,
        vecs=jnp.asarray(vecs),
    )


def init_params(key):
    ks = iter(jax.random.split(key, 32))

    def dense(din, dout):
        return jax.random.normal(next(ks), (din, dout), jnp.float32) / math.sqrt(din)

    def vec(n, scale=0.1):
        return jax.random.normal(next(ks), (n,), jnp.float32) * scale

    p = {}
    p['embed'] = jax.random.normal(next(ks), (VOCAB, HIDDEN), jnp.float32) * 0.02
    for n in ('wq', 'wk', 'wv', 'wo'):
        p[n] = dense(HIDDEN, HIDDEN)
    for n in ('bq', 'bk', 'bv', 'bo'):
        p[n] = vec(HIDDEN)
    p['ln1_g'] = 1.0 + vec(HIDDEN); p['ln1_b'] = vec(HIDDEN)
    p['w1'] = dense(HIDDEN, FFN);   p['b1'] = vec(FFN)
    p['w2'] = dense(FFN, HIDDEN);   p['b2'] = vec(HIDDEN)
    p['ln2_g'] = 1.0 + vec(HIDDEN); p['ln2_b'] = vec(HIDDEN)
    p['conv_w_pt'] = (jax.random.normal(next(ks), (CONV_C, IMG_C, 3, 3), jnp.float32)
                      / math.sqrt(IMG_C * 9))
    p['conv_b'] = vec(CONV_C)
    p['text_fc_w'] = dense(HIDDEN, PROJ); p['text_fc_b'] = vec(PROJ)
    p['img_fc_w'] = dense(CONV_C, PROJ);  p['img_fc_b'] = vec(PROJ)
    p['cls_w'] = dense(2 * PROJ, NUM_LABELS); p['cls_b'] = vec(NUM_LABELS)
    return p


# -------------------------- pure-JAX reference -------------------------------
def reference_forward(p, input_ids, attention_mask, images):
    x = jnp.take(p['embed'], input_ids, axis=0)                         # (B, S, H)
    mask_bias = (1.0 - attention_mask.astype(jnp.float32)) * (-1e9)
    q = x[:, 0, :] @ p['wq'] + p['bq']
    k = jnp.einsum('bsh,hd->bsd', x, p['wk']) + p['bk']
    v = jnp.einsum('bsh,hd->bsd', x, p['wv']) + p['bv']
    sc = jnp.einsum('bh,bsh->bs', q, k) / math.sqrt(HIDDEN) + mask_bias
    pw = jax.nn.softmax(sc, axis=-1)
    ctx = jnp.einsum('bs,bsh->bh', pw, v)
    h1 = _layernorm(x[:, 0, :] + ctx @ p['wo'] + p['bo'], p['ln1_g'], p['ln1_b'])
    ff = jax.nn.gelu(h1 @ p['w1'] + p['b1'], approximate=True)
    cls = _layernorm(h1 + ff @ p['w2'] + p['b2'], p['ln2_g'], p['ln2_b'])
    text_embed = cls @ p['text_fc_w'] + p['text_fc_b']

    y = jax.lax.conv_general_dilated(images, p['conv_w_pt'], (1, 1), 'SAME',
                                     dimension_numbers=('NCHW', 'OIHW', 'NCHW'))
    y = jax.nn.relu(y + p['conv_b'][None, :, None, None])
    feat = jnp.mean(y, axis=(2, 3))                                     # (B, CONV_C)
    img_embed = feat @ p['img_fc_w'] + p['img_fc_b']

    fusion = jnp.concatenate([text_embed, img_embed], axis=1)
    return fusion @ p['cls_w'] + p['cls_b']


# --------------------------------- main ---------------------------------------
if __name__ == "__main__":
    key = jax.random.PRNGKey(0)
    k_param, k_ids, k_img = jax.random.split(key, 3)

    params = init_params(k_param)
    packed = pack_params(params)

    input_ids = jax.random.randint(k_ids, (BATCH, SEQ), 0, VOCAB, dtype=jnp.int32)
    attention_mask = jnp.ones((BATCH, SEQ), jnp.float32).at[1, 6:].set(0.0)
    images = jax.random.normal(k_img, (BATCH, IMG_C, IMG_H, IMG_W), jnp.float32)

    logits = jax.jit(multimodal_forward)(packed, input_ids, attention_mask, images)
    jax.block_until_ready(logits)
    assert logits.shape == (BATCH, NUM_LABELS) and logits.dtype == jnp.float32

    # Reference uses the same bf16-quantized weights the kernel consumes (bf16 weight
    # storage is a deliberate DMA optimization); activations stay f32 in both paths.
    qnames = ('embed', 'wq', 'wk', 'wv', 'wo', 'w1', 'w2', 'conv_w_pt',
              'text_fc_w', 'img_fc_w', 'cls_w')
    params_q = {name: (val.astype(jnp.bfloat16).astype(jnp.float32)
                       if name in qnames else val)
                for name, val in params.items()}
    ref = reference_forward(params_q, input_ids, attention_mask, images)
    np.testing.assert_allclose(np.asarray(logits), np.asarray(ref),
                               rtol=2e-2, atol=2e-2)
    print("KERNEL_OK")
</pallas_src>

<mosaic_0001>
module attributes {stable_mosaic.version = 11 : i64} {
  func.func @fused_kernel(%arg0: memref<16x1xi32, #tpu.memory_space<vmem>>, %arg1: memref<2x16xf32, #tpu.memory_space<vmem>>, %arg2: memref<32x162xf32, #tpu.memory_space<vmem>>, %arg3: memref<128x32xbf16, #tpu.memory_space<vmem>>, %arg4: memref<32x448xbf16, #tpu.memory_space<vmem>>, %arg5: memref<64x32xbf16, #tpu.memory_space<vmem>>, %arg6: memref<162x256xbf16, #tpu.memory_space<vmem>>, %arg7: memref<16x256xbf16, #tpu.memory_space<vmem>>, %arg8: memref<512x8xbf16, #tpu.memory_space<vmem>>, %arg9: memref<16x256xf32, #tpu.memory_space<vmem>>, %arg10: memref<2x8xf32, #tpu.memory_space<vmem>>) attributes {dimension_semantics = [], scalar_prefetch = 0 : i64, scratch_operands = 0 : i64, tpu.core_type = #tpu.core_type<tc>} {
    %c0 = arith.constant 0 : index
    %c0_0 = arith.constant 0 : index
    %0 = vector.load %arg9[%c0, %c0_0] : memref<16x256xf32, #tpu.memory_space<vmem>>, vector<1x32xf32>
    %c1 = arith.constant 1 : index
    %c0_1 = arith.constant 0 : index
    %1 = vector.load %arg9[%c1, %c0_1] : memref<16x256xf32, #tpu.memory_space<vmem>>, vector<1x32xf32>
    %c2 = arith.constant 2 : index
    %c0_2 = arith.constant 0 : index
    %2 = vector.load %arg9[%c2, %c0_2] : memref<16x256xf32, #tpu.memory_space<vmem>>, vector<1x32xf32>
    %c3 = arith.constant 3 : index
    %c0_3 = arith.constant 0 : index
    %3 = vector.load %arg9[%c3, %c0_3] : memref<16x256xf32, #tpu.memory_space<vmem>>, vector<1x32xf32>
    %c4 = arith.constant 4 : index
    %c0_4 = arith.constant 0 : index
    %4 = vector.load %arg9[%c4, %c0_4] : memref<16x256xf32, #tpu.memory_space<vmem>>, vector<1x32xf32>
    %c5 = arith.constant 5 : index
    %c0_5 = arith.constant 0 : index
    %5 = vector.load %arg9[%c5, %c0_5] : memref<16x256xf32, #tpu.memory_space<vmem>>, vector<1x32xf32>
    %c6 = arith.constant 6 : index
    %c0_6 = arith.constant 0 : index
    %6 = vector.load %arg9[%c6, %c0_6] : memref<16x256xf32, #tpu.memory_space<vmem>>, vector<1x32xf32>
    %c7 = arith.constant 7 : index
    %c0_7 = arith.constant 0 : index
    %7 = vector.load %arg9[%c7, %c0_7] : memref<16x256xf32, #tpu.memory_space<vmem>>, vector<1x32xf32>
    %c8 = arith.constant 8 : index
    %c0_8 = arith.constant 0 : index
    %8 = vector.load %arg9[%c8, %c0_8] : memref<16x256xf32, #tpu.memory_space<vmem>>, vector<1x64xf32>
    %c9 = arith.constant 9 : index
    %c0_9 = arith.constant 0 : index
    %9 = vector.load %arg9[%c9, %c0_9] : memref<16x256xf32, #tpu.memory_space<vmem>>, vector<1x32xf32>
    %c10 = arith.constant 10 : index
    %c0_10 = arith.constant 0 : index
    %10 = vector.load %arg9[%c10, %c0_10] : memref<16x256xf32, #tpu.memory_space<vmem>>, vector<1x256xf32>
    %c11 = arith.constant 11 : index
    %c0_11 = arith.constant 0 : index
    %11 = vector.load %arg9[%c11, %c0_11] : memref<16x256xf32, #tpu.memory_space<vmem>>, vector<1x256xf32>
    %c12 = arith.constant 12 : index
    %c0_12 = arith.constant 0 : index
    %12 = vector.load %arg9[%c12, %c0_12] : memref<16x256xf32, #tpu.memory_space<vmem>>, vector<1x256xf32>
    %c13 = arith.constant 13 : index
    %c0_13 = arith.constant 0 : index
    %13 = vector.load %arg9[%c13, %c0_13] : memref<16x256xf32, #tpu.memory_space<vmem>>, vector<1x8xf32>
    %c0_14 = arith.constant 0 : index
    %c0_15 = arith.constant 0 : index
    %14 = vector.load %arg0[%c0_14, %c0_15] : memref<16x1xi32, #tpu.memory_space<vmem>>, vector<16x1xi32>
    %15 = tpu.iota {dimensions = array<i32: 1>} : vector<16x128xi32>
    %16 = vector.broadcast %14 : vector<16x1xi32> to vector<16x128xi32>
    %17 = arith.cmpi eq, %15, %16 : vector<16x128xi32>
    %18 = arith.extui %17 : vector<16x128xi1> to vector<16x128xi32>
    %19 = arith.sitofp %18 : vector<16x128xi32> to vector<16x128xf32>
    %20 = arith.truncf %19 : vector<16x128xf32> to vector<16x128xbf16>
    %c0_16 = arith.constant 0 : index
    %c0_17 = arith.constant 0 : index
    %21 = vector.load %arg3[%c0_16, %c0_17] : memref<128x32xbf16, #tpu.memory_space<vmem>>, vector<128x32xbf16>
    %cst = arith.constant dense<0.000000e+00> : vector<16x32xf32>
    %22 = tpu.matmul %20, %21, %cst {dimension_numbers = #tpu.dot_dimension_numbers<[1], [0], [0], [1], [0, 0, 1, 1], [], []>} : vector<16x128xbf16>, vector<128x32xbf16>, vector<16x32xf32> -> vector<16x32xf32>
    %23 = arith.truncf %22 : vector<16x32xf32> to vector<16x32xbf16>
    %c0_18 = arith.constant 0 : index
    %c0_19 = arith.constant 0 : index
    %24 = vector.load %arg4[%c0_18, %c0_19] : memref<32x448xbf16, #tpu.memory_space<vmem>>, vector<32x96xbf16>
    %cst_20 = arith.constant dense<0.000000e+00> : vector<16x96xf32>
    %25 = tpu.matmul %23, %24, %cst_20 {dimension_numbers = #tpu.dot_dimension_numbers<[1], [0], [0], [1], [0, 0, 1, 1], [], []>} : vector<16x32xbf16>, vector<32x96xbf16>, vector<16x96xf32> -> vector<16x96xf32>
    %26 = vector.extract_strided_slice %25 {offsets = [0, 32], sizes = [16, 32], strides = [1, 1]} : vector<16x96xf32> to vector<16x32xf32>
    %27 = vector.broadcast %1 : vector<1x32xf32> to vector<16x32xf32>
    %28 = arith.addf %26, %27 : vector<16x32xf32>
    %29 = vector.extract_strided_slice %25 {offsets = [0, 64], sizes = [16, 32], strides = [1, 1]} : vector<16x96xf32> to vector<16x32xf32>
    %30 = vector.broadcast %2 : vector<1x32xf32> to vector<16x32xf32>
    %31 = arith.addf %29, %30 : vector<16x32xf32>
    %32 = vector.extract_strided_slice %22 {offsets = [0, 0], sizes = [1, 32], strides = [1, 1]} : vector<16x32xf32> to vector<1x32xf32>
    %33 = vector.extract_strided_slice %22 {offsets = [8, 0], sizes = [1, 32], strides = [1, 1]} : vector<16x32xf32> to vector<1x32xf32>
    %34 = tpu.concatenate %32, %33 in 0 : vector<1x32xf32>, vector<1x32xf32> -> vector<2x32xf32>
    %35 = vector.extract_strided_slice %25 {offsets = [0, 0], sizes = [1, 32], strides = [1, 1]} : vector<16x96xf32> to vector<1x32xf32>
    %36 = vector.extract_strided_slice %25 {offsets = [8, 0], sizes = [1, 32], strides = [1, 1]} : vector<16x96xf32> to vector<1x32xf32>
    %37 = tpu.concatenate %35, %36 in 0 : vector<1x32xf32>, vector<1x32xf32> -> vector<2x32xf32>
    %38 = vector.broadcast %0 : vector<1x32xf32> to vector<2x32xf32>
    %39 = arith.addf %37, %38 : vector<2x32xf32>
    %cst_21 = arith.constant dense<0.000000e+00> : vector<2x16xf32>
    %40 = tpu.matmul %39, %28, %cst_21 {dimension_numbers = #tpu.dot_dimension_numbers<[1], [1], [0], [0], [0, 0, 1, 0], [], []>} : vector<2x32xf32>, vector<16x32xf32>, vector<2x16xf32> -> vector<2x16xf32>
    %cst_22 = arith.constant 0.176776692 : f32
    %41 = vector.broadcast %cst_22 : f32 to vector<2x16xf32>
    %42 = arith.mulf %40, %41 : vector<2x16xf32>
    %c0_23 = arith.constant 0 : index
    %c0_24 = arith.constant 0 : index
    %43 = vector.load %arg1[%c0_23, %c0_24] : memref<2x16xf32, #tpu.memory_space<vmem>>, vector<2x16xf32>
    %44 = arith.addf %42, %43 : vector<2x16xf32>
    %cst_25 = arith.constant dense<0xFF800000> : vector<2xf32>
    %45 = vector.multi_reduction <maximumf>, %44, %cst_25 [1] : vector<2x16xf32> to vector<2xf32>
    %46 = vector.shape_cast %45 : vector<2xf32> to vector<2x1xf32>
    %47 = vector.broadcast %46 : vector<2x1xf32> to vector<2x16xf32>
    %48 = arith.subf %44, %47 : vector<2x16xf32>
    %49 = math.exp %48 : vector<2x16xf32>
    %cst_26 = arith.constant dense<0.000000e+00> : vector<2xf32>
    %50 = vector.multi_reduction <add>, %49, %cst_26 [1] : vector<2x16xf32> to vector<2xf32>
    %51 = vector.shape_cast %50 : vector<2xf32> to vector<2x1xf32>
    %52 = tpu.reciprocal %51 {approx = true} : vector<2x1xf32> -> vector<2x1xf32>
    %53 = vector.broadcast %52 : vector<2x1xf32> to vector<2x16xf32>
    %54 = arith.mulf %49, %53 : vector<2x16xf32>
    %cst_27 = arith.constant dense<0.000000e+00> : vector<2x32xf32>
    %55 = tpu.matmul %54, %31, %cst_27 {dimension_numbers = #tpu.dot_dimension_numbers<[1], [0], [0], [1], [0, 0, 1, 1], [], []>} : vector<2x16xf32>, vector<16x32xf32>, vector<2x32xf32> -> vector<2x32xf32>
    %56 = arith.truncf %55 : vector<2x32xf32> to vector<2x32xbf16>
    %c0_28 = arith.constant 0 : index
    %c96 = arith.constant 96 : index
    %57 = vector.load %arg4[%c0_28, %c96] : memref<32x448xbf16, #tpu.memory_space<vmem>>, vector<32x32xbf16>
    %cst_29 = arith.constant dense<0.000000e+00> : vector<2x32xf32>
    %58 = tpu.matmul %56, %57, %cst_29 {dimension_numbers = #tpu.dot_dimension_numbers<[1], [0], [0], [1], [0, 0, 1, 1], [], []>} : vector<2x32xbf16>, vector<32x32xbf16>, vector<2x32xf32> -> vector<2x32xf32>
    %59 = vector.broadcast %3 : vector<1x32xf32> to vector<2x32xf32>
    %60 = arith.addf %58, %59 : vector<2x32xf32>
    %61 = arith.addf %34, %60 : vector<2x32xf32>
    %cst_30 = arith.constant dense<0.000000e+00> : vector<2xf32>
    %62 = vector.multi_reduction <add>, %61, %cst_30 [1] : vector<2x32xf32> to vector<2xf32>
    %63 = vector.shape_cast %62 : vector<2xf32> to vector<2x1xf32>
    %cst_31 = arith.constant 3.200000e+01 : f32
    %64 = vector.broadcast %cst_31 : f32 to vector<2x1xf32>
    %65 = arith.divf %63, %64 : vector<2x1xf32>
    %66 = vector.broadcast %65 : vector<2x1xf32> to vector<2x32xf32>
    %67 = arith.subf %61, %66 : vector<2x32xf32>
    %68 = arith.mulf %67, %67 : vector<2x32xf32>
    %cst_32 = arith.constant dense<0.000000e+00> : vector<2xf32>
    %69 = vector.multi_reduction <add>, %68, %cst_32 [1] : vector<2x32xf32> to vector<2xf32>
    %70 = vector.shape_cast %69 : vector<2xf32> to vector<2x1xf32>
    %cst_33 = arith.constant 3.200000e+01 : f32
    %71 = vector.broadcast %cst_33 : f32 to vector<2x1xf32>
    %72 = arith.divf %70, %71 : vector<2x1xf32>
    %73 = vector.broadcast %65 : vector<2x1xf32> to vector<2x32xf32>
    %74 = arith.subf %61, %73 : vector<2x32xf32>
    %cst_34 = arith.constant 9.99999996E-13 : f32
    %75 = vector.broadcast %cst_34 : f32 to vector<2x1xf32>
    %76 = arith.addf %72, %75 : vector<2x1xf32>
    %77 = math.rsqrt %76 : vector<2x1xf32>
    %78 = vector.broadcast %77 : vector<2x1xf32> to vector<2x32xf32>
    %79 = arith.mulf %74, %78 : vector<2x32xf32>
    %80 = vector.broadcast %4 : vector<1x32xf32> to vector<2x32xf32>
    %81 = arith.mulf %79, %80 : vector<2x32xf32>
    %82 = vector.broadcast %5 : vector<1x32xf32> to vector<2x32xf32>
    %83 = arith.addf %81, %82 : vector<2x32xf32>
    %84 = arith.truncf %83 : vector<2x32xf32> to vector<2x32xbf16>
    %c0_35 = arith.constant 0 : index
    %c384 = arith.constant 384 : index
    %85 = vector.load %arg4[%c0_35, %c384] : memref<32x448xbf16, #tpu.memory_space<vmem>>, vector<32x64xbf16>
    %cst_36 = arith.constant dense<0.000000e+00> : vector<2x64xf32>
    %86 = tpu.matmul %84, %85, %cst_36 {dimension_numbers = #tpu.dot_dimension_numbers<[1], [0], [0], [1], [0, 0, 1, 1], [], []>} : vector<2x32xbf16>, vector<32x64xbf16>, vector<2x64xf32> -> vector<2x64xf32>
    %87 = vector.broadcast %8 : vector<1x64xf32> to vector<2x64xf32>
    %88 = arith.addf %86, %87 : vector<2x64xf32>
    %89 = arith.mulf %88, %88 : vector<2x64xf32>
    %90 = arith.mulf %88, %89 : vector<2x64xf32>
    %cst_37 = arith.constant 4.471500e-02 : f32
    %91 = vector.broadcast %cst_37 : f32 to vector<2x64xf32>
    %92 = arith.mulf %91, %90 : vector<2x64xf32>
    %93 = arith.addf %88, %92 : vector<2x64xf32>
    %cst_38 = arith.constant 0.797884583 : f32
    %94 = vector.broadcast %cst_38 : f32 to vector<2x64xf32>
    %95 = arith.mulf %94, %93 : vector<2x64xf32>
    %96 = math.tanh %95 : vector<2x64xf32>
    %cst_39 = arith.constant 1.000000e+00 : f32
    %97 = vector.broadcast %cst_39 : f32 to vector<2x64xf32>
    %98 = arith.addf %97, %96 : vector<2x64xf32>
    %cst_40 = arith.constant 5.000000e-01 : f32
    %99 = vector.broadcast %cst_40 : f32 to vector<2x64xf32>
    %100 = arith.mulf %99, %98 : vector<2x64xf32>
    %101 = arith.mulf %88, %100 : vector<2x64xf32>
    %102 = arith.truncf %101 : vector<2x64xf32> to vector<2x64xbf16>
    %c0_41 = arith.constant 0 : index
    %c0_42 = arith.constant 0 : index
    %103 = vector.load %arg5[%c0_41, %c0_42] : memref<64x32xbf16, #tpu.memory_space<vmem>>, vector<64x32xbf16>
    %cst_43 = arith.constant dense<0.000000e+00> : vector<2x32xf32>
    %104 = tpu.matmul %102, %103, %cst_43 {dimension_numbers = #tpu.dot_dimension_numbers<[1], [0], [0], [1], [0, 0, 1, 1], [], []>} : vector<2x64xbf16>, vector<64x32xbf16>, vector<2x32xf32> -> vector<2x32xf32>
    %105 = vector.broadcast %9 : vector<1x32xf32> to vector<2x32xf32>
    %106 = arith.addf %104, %105 : vector<2x32xf32>
    %107 = arith.addf %83, %106 : vector<2x32xf32>
    %cst_44 = arith.constant dense<0.000000e+00> : vector<2xf32>
    %108 = vector.multi_reduction <add>, %107, %cst_44 [1] : vector<2x32xf32> to vector<2xf32>
    %109 = vector.shape_cast %108 : vector<2xf32> to vector<2x1xf32>
    %cst_45 = arith.constant 3.200000e+01 : f32
    %110 = vector.broadcast %cst_45 : f32 to vector<2x1xf32>
    %111 = arith.divf %109, %110 : vector<2x1xf32>
    %112 = vector.broadcast %111 : vector<2x1xf32> to vector<2x32xf32>
    %113 = arith.subf %107, %112 : vector<2x32xf32>
    %114 = arith.mulf %113, %113 : vector<2x32xf32>
    %cst_46 = arith.constant dense<0.000000e+00> : vector<2xf32>
    %115 = vector.multi_reduction <add>, %114, %cst_46 [1] : vector<2x32xf32> to vector<2xf32>
    %116 = vector.shape_cast %115 : vector<2xf32> to vector<2x1xf32>
    %cst_47 = arith.constant 3.200000e+01 : f32
    %117 = vector.broadcast %cst_47 : f32 to vector<2x1xf32>
    %118 = arith.divf %116, %117 : vector<2x1xf32>
    %119 = vector.broadcast %111 : vector<2x1xf32> to vector<2x32xf32>
    %120 = arith.subf %107, %119 : vector<2x32xf32>
    %cst_48 = arith.constant 9.99999996E-13 : f32
    %121 = vector.broadcast %cst_48 : f32 to vector<2x1xf32>
    %122 = arith.addf %118, %121 : vector<2x1xf32>
    %123 = math.rsqrt %122 : vector<2x1xf32>
    %124 = vector.broadcast %123 : vector<2x1xf32> to vector<2x32xf32>
    %125 = arith.mulf %120, %124 : vector<2x32xf32>
    %126 = vector.broadcast %6 : vector<1x32xf32> to vector<2x32xf32>
    %127 = arith.mulf %125, %126 : vector<2x32xf32>
    %128 = vector.broadcast %7 : vector<1x32xf32> to vector<2x32xf32>
    %129 = arith.addf %127, %128 : vector<2x32xf32>
    %130 = arith.truncf %129 : vector<2x32xf32> to vector<2x32xbf16>
    %c0_49 = arith.constant 0 : index
    %c128 = arith.constant 128 : index
    %131 = vector.load %arg4[%c0_49, %c128] : memref<32x448xbf16, #tpu.memory_space<vmem>>, vector<32x256xbf16>
    %cst_50 = arith.constant dense<0.000000e+00> : vector<2x256xf32>
    %132 = tpu.matmul %130, %131, %cst_50 {dimension_numbers = #tpu.dot_dimension_numbers<[1], [0], [0], [1], [0, 0, 1, 1], [], []>} : vector<2x32xbf16>, vector<32x256xbf16>, vector<2x256xf32> -> vector<2x256xf32>
    %133 = vector.broadcast %11 : vector<1x256xf32> to vector<2x256xf32>
    %134 = arith.addf %132, %133 : vector<2x256xf32>
    %c0_51 = arith.constant 0 : index
    %c0_52 = arith.constant 0 : index
    %135 = vector.load %arg2[%c0_51, %c0_52] : memref<32x162xf32, #tpu.memory_space<vmem>>, vector<32x162xf32>
    %136 = arith.truncf %135 : vector<32x162xf32> to vector<32x162xbf16>
    %c0_53 = arith.constant 0 : index
    %c0_54 = arith.constant 0 : index
    %137 = vector.load %arg6[%c0_53, %c0_54] : memref<162x256xbf16, #tpu.memory_space<vmem>>, vector<162x256xbf16>
    %cst_55 = arith.constant dense<0.000000e+00> : vector<32x256xf32>
    %138 = tpu.matmul %136, %137, %cst_55 {dimension_numbers = #tpu.dot_dimension_numbers<[1], [0], [0], [1], [0, 0, 1, 1], [], []>} : vector<32x162xbf16>, vector<162x256xbf16>, vector<32x256xf32> -> vector<32x256xf32>
    %139 = vector.broadcast %10 : vector<1x256xf32> to vector<32x256xf32>
    %140 = arith.addf %138, %139 : vector<32x256xf32>
    %cst_56 = arith.constant 0.000000e+00 : f32
    %141 = vector.broadcast %cst_56 : f32 to vector<32x256xf32>
    %142 = arith.maximumf %140, %141 : vector<32x256xf32>
    %143 = vector.extract_strided_slice %142 {offsets = [0, 0], sizes = [16, 256], strides = [1, 1]} : vector<32x256xf32> to vector<16x256xf32>
    %cst_57 = arith.constant dense<0.000000e+00> : vector<256xf32>
    %144 = vector.multi_reduction <add>, %143, %cst_57 [0] : vector<16x256xf32> to vector<256xf32>
    %145 = vector.shape_cast %144 : vector<256xf32> to vector<1x256xf32>
    %146 = vector.extract_strided_slice %142 {offsets = [16, 0], sizes = [16, 256], strides = [1, 1]} : vector<32x256xf32> to vector<16x256xf32>
    %cst_58 = arith.constant dense<0.000000e+00> : vector<256xf32>
    %147 = vector.multi_reduction <add>, %146, %cst_58 [0] : vector<16x256xf32> to vector<256xf32>
    %148 = vector.shape_cast %147 : vector<256xf32> to vector<1x256xf32>
    %149 = tpu.concatenate %145, %148 in 0 : vector<1x256xf32>, vector<1x256xf32> -> vector<2x256xf32>
    %150 = tpu.iota {dimensions = array<i32: 0>} : vector<256x16xi32>
    %151 = tpu.iota {dimensions = array<i32: 1>} : vector<256x16xi32>
    %c15_i32 = arith.constant 15 : i32
    %152 = vector.broadcast %c15_i32 : i32 to vector<256x16xi32>
    %153 = arith.andi %150, %152 : vector<256x16xi32>
    %154 = arith.cmpi eq, %153, %151 : vector<256x16xi32>
    %155 = arith.extui %154 : vector<256x16xi1> to vector<256x16xi32>
    %156 = arith.sitofp %155 : vector<256x16xi32> to vector<256x16xf32>
    %cst_59 = arith.constant dense<0.000000e+00> : vector<2x16xf32>
    %157 = tpu.matmul %149, %156, %cst_59 {dimension_numbers = #tpu.dot_dimension_numbers<[1], [0], [0], [1], [0, 0, 1, 1], [], []>} : vector<2x256xf32>, vector<256x16xf32>, vector<2x16xf32> -> vector<2x16xf32>
    %158 = arith.truncf %157 : vector<2x16xf32> to vector<2x16xbf16>
    %c0_60 = arith.constant 0 : index
    %c0_61 = arith.constant 0 : index
    %159 = vector.load %arg7[%c0_60, %c0_61] : memref<16x256xbf16, #tpu.memory_space<vmem>>, vector<16x256xbf16>
    %cst_62 = arith.constant dense<0.000000e+00> : vector<2x256xf32>
    %160 = tpu.matmul %158, %159, %cst_62 {dimension_numbers = #tpu.dot_dimension_numbers<[1], [0], [0], [1], [0, 0, 1, 1], [], []>} : vector<2x16xbf16>, vector<16x256xbf16>, vector<2x256xf32> -> vector<2x256xf32>
    %161 = vector.broadcast %12 : vector<1x256xf32> to vector<2x256xf32>
    %162 = arith.addf %160, %161 : vector<2x256xf32>
    %163 = arith.truncf %134 : vector<2x256xf32> to vector<2x256xbf16>
    %c0_63 = arith.constant 0 : index
    %c0_64 = arith.constant 0 : index
    %164 = vector.load %arg8[%c0_63, %c0_64] : memref<512x8xbf16, #tpu.memory_space<vmem>>, vector<256x8xbf16>
    %cst_65 = arith.constant dense<0.000000e+00> : vector<2x8xf32>
    %165 = tpu.matmul %163, %164, %cst_65 {dimension_numbers = #tpu.dot_dimension_numbers<[1], [0], [0], [1], [0, 0, 1, 1], [], []>} : vector<2x256xbf16>, vector<256x8xbf16>, vector<2x8xf32> -> vector<2x8xf32>
    %166 = arith.truncf %162 : vector<2x256xf32> to vector<2x256xbf16>
    %c256 = arith.constant 256 : index
    %c0_66 = arith.constant 0 : index
    %167 = vector.load %arg8[%c256, %c0_66] : memref<512x8xbf16, #tpu.memory_space<vmem>>, vector<256x8xbf16>
    %cst_67 = arith.constant dense<0.000000e+00> : vector<2x8xf32>
    %168 = tpu.matmul %166, %167, %cst_67 {dimension_numbers = #tpu.dot_dimension_numbers<[1], [0], [0], [1], [0, 0, 1, 1], [], []>} : vector<2x256xbf16>, vector<256x8xbf16>, vector<2x8xf32> -> vector<2x8xf32>
    %169 = arith.addf %165, %168 : vector<2x8xf32>
    %170 = vector.broadcast %13 : vector<1x8xf32> to vector<2x8xf32>
    %171 = arith.addf %169, %170 : vector<2x8xf32>
    %c0_68 = arith.constant 0 : index
    %c0_69 = arith.constant 0 : index
    %172 = vector.load %arg10[%c0_68, %c0_69] : memref<2x8xf32, #tpu.memory_space<vmem>>, vector<2x8xf32>
    tpu.vector_store %arg10[%c0_68, %c0_69], %171 {strides = array<i32>} : memref<2x8xf32, #tpu.memory_space<vmem>>, vector<2x8xf32>,
    return
  }
}

</mosaic_0001>

<bundles_post_ra>
// kernel: multimodal_forward.1
= control target key start
LH: loop header
LB: loop body
LE: loop exit
PB: predicated region body
PF: predicated region fallthrough
CT: control target
= control target key end

     0   :  { %v1876_v2 = vmov 0   ;;  %s2512_s0 = inlined_call_operand.vmem [shape: s32[16,1], index: 0, kind: input, shape index: {}]   ;;  %s2513_s1 = inlined_call_operand.vmem [shape: f32[2,16], index: 1, kind: input, shape index: {}]   ;;  %s2514_s2 = inlined_call_operand.vmem [shape: f32[32,162], index: 2, kind: input, shape index: {}]   ;;  %s2515_s3 = inlined_call_operand.vmem [shape: bf16[128,32], index: 3, kind: input, shape index: {}]   ;;  %s2516_s4 = inlined_call_operand.vmem [shape: bf16[32,448], index: 4, kind: input, shape index: {}]   ;;  %s2517_s5 = inlined_call_operand.vmem [shape: bf16[64,32], index: 5, kind: input, shape index: {}]   ;;  %s2518_s6 = inlined_call_operand.vmem [shape: bf16[162,256], index: 6, kind: input, shape index: {}]   ;;  %s2519_s7 = inlined_call_operand.vmem [shape: bf16[16,256], index: 7, kind: input, shape index: {}]   ;;  %s2520_s8 = inlined_call_operand.vmem [shape: bf16[512,8], index: 8, kind: input, shape index: {}]   ;;  %s2521_s9 = inlined_call_operand.vmem [shape: f32[16,256], index: 9, kind: input, shape index: {}]   ;;  %s2522_s10 = inlined_call_operand.hbm [shape: f32[2,8], index: 10, kind: output, shape index: {}]  }
   0x1   :  { %v54_v0 = vld [vmem:[%s2512_s0] sm:$0xff]  ;;  %v1757_v1 = vld [vmem:[%s2515_s3 + $0x38] sm:$0xff]  ;;  %1832 = vset.pattern.permute.xlu0 %v1876_v2  ;;  %v1756_v3 = vld [vmem:[%s2515_s3 + $0x30] sm:$0xff] }
   0x2   :  { %59 = vperm.xlu0 %1832, %v54_v0   ;;  %135 = vmatpush.bf16.msra.mxu0 %v1757_v1 }
   0x3   :  { %15 = vsyncpa [#allocation3], 0  ;;  %v1755_v4 = vld [vmem:[%s2515_s3 + $0x28] sm:$0xff]  ;;  %v1754_v6 = vld [vmem:[%s2515_s3 + $0x20] sm:$0xff]  ;;  %v56_v15 = vlaneseq  ;;  %v1877_v18 = vmov 1.0|1.0  }
   0x4   :  { %v55_v5 = vld [vmem:[%s2512_s0 + $0x8] sm:$0xff]  ;;  %v1753_v7 = vld [vmem:[%s2515_s3 + $0x18] sm:$0xff]  ;;  %v1752_v8 = vld [vmem:[%s2515_s3 + $0x10] sm:$0xff]  ;;  %s1878_s23 = smov 64   ;;  %s1879_s24 = smov 32   ;;  %vm166_vm3 = vcmask 261120  }
   0x5   :  { %v1751_v9 = vld [vmem:[%s2515_s3 + $0x8] sm:$0xff]  ;;  %v1750_v10 = vld [vmem:[%s2515_s3] sm:$0xff]  ;;  %v1759_v12 = vld [vmem:[%s2516_s4 + $0x2c] sm:$0xf0]  ;;  %v1976_v16 = vand.u32 127, %v56_v15  ;;  %s1880_s25 = smov 96  }
   0x6   :  { %136 = vmatpush.bf16.msra.mxu0 %v1756_v3  ;;  %v1412_v11 = vld [vmem:[%s2516_s4 + $0x20] sm:$0xf]  ;;  %v1758_v20 = vld [vmem:[%s2516_s4 + $0xc] sm:$0xf0]  ;;  %vm199_vm4 = vcmask 1040384   ;;  %vm242_vm5 = vcmask 123904  }
   0x7   :  { %v1413_v13 = vor.u32 %v1759_v12, %v1412_v11  ;;  %v1408_v19 = vld [vmem:[%s2516_s4] sm:$0xf]  ;;  %vm262_vm6 = vcmask 130048   ;;  %vm310_vm7 = vcmask 254976   ;;  %vm417_vm12 = vcmask 523264   ;;  %s1883_s22 = smov [#allocation2]  }
   0x8   :  { %v1409_v21 = vor.u32 %v1758_v20, %v1408_v19  ;;  %v39_v22 = vld [vmem:[%s2521_s9 + $0x2] ss:$0 sm:$0xff]  ;;  %v38_v23 = vld [vmem:[%s2521_s9 + $0x1] ss:$0 sm:$0xff]  ;;  %v37_v40 = vld [vmem:[%s2521_s9] ss:$0 sm:$0xff] }
   0x9   :  { %185 = vrot.lane.b32.xlu1 %v38_v23, %s1879_s24  ;;  %v240_v46 = vld [vmem:[%s2513_s1] sm:$0x3]  ;;  %v40_v63 = vld [vmem:[%s2521_s9 + $0x3] ss:$0 sm:$0xff]  ;;  %v1426_v20 = vld [vmem:[%s2516_s4 + $0x2c] sm:$0xf] }
   0xa   :  { %62 = vperm.xlu0 %1832, %v55_v5   ;;  %137 = vmatpush.bf16.msra.mxu0 %v1755_v4  ;;  %v1422_v23 = vld [vmem:[%s2516_s4 + $0xc] sm:$0xf]  ;;  %s1358_s26 = sshll.u32 %s2522_s10, 4  ;;  %s1359_s26 = int_to_ptr.hbm [resolvable:$true] %s1358_s26 }
   0xe   :  { %138 = vmatpush.bf16.msra.mxu0 %v1754_v6  ;;  %v1881_v6 = vmov 32.0  }
  0x12   :  { %139 = vmatpush.bf16.msra.mxu0 %v1753_v7  ;;  %191 = vrot.lane.b32.xlu0 %v39_v22, %s1878_s23 }
  0x16   :  { %140 = vmatpush.bf16.msra.mxu0 %v1752_v8 }
  0x1a   :  { %141 = vmatpush.bf16.msra.mxu0 %v1751_v9 }
  0x1e   :  { %142 = vmatpush.bf16.msra.mxu0 %v1750_v10 }
  0x22   :  { %176 = vmatpush.bf16.msrb.mxu0 %v1413_v13 }
  0x26   :  { %177 = vmatpush.bf16.msrb.mxu0 %v1409_v21 }
  0x74   :  { %v60_v14 = vpop.permute.xlu0 %59 }
  0x75   :  { %vm64_vm0 = vcmp.eq.s32.totalorder %v1976_v16, %v60_v14 }
  0x7b   :  { %v186_v27 = vpop.permute.xlu1 %185 }
  0x7c   :  { %v63_v17 = vpop.permute.xlu0 %62 }
  0x7d   :  { %vm65_vm1 = vcmp.eq.s32.totalorder %v1976_v16, %v63_v17 }
  0x7e   :  { %vm1404_vm2 = vmpackc.low %vm65_vm1, %vm64_vm0  ;;  %vm661_vm0 = vcmask 277504  }
  0x7f   :  { %1405 = vmatmul.msk.bf16.vlgmr.msra.gmra.mxu0 %vm1404_vm2, %v1877_v18 }
  0x84   :  { %v192_v30 = vpop.permute.xlu0 %191 }
  0xfc   :  { %v1992_v24 = vpop.f32.mrf.mxu0 }
 0x104   :  { %v1994_v25 = vpop.f32.mrf.mxu0 }
 0x105   :  { %v149_v26 = vpack.c.bf16 %v1994_v25, %v1992_v24  ;;  %v197_v62 = vrot.slane %v1994_v25, 7 }
 0x107   :  { %1414 = vmatmul.msk.bf16.vlgmr.msrb.gmra.mxu0 %vm166_vm3, %v149_v26  ;;  %v200_v2 = vsel %vm199_vm4, %v1992_v24, %v197_v62  ;;  %v1760_v24 = vld [vmem:[%s2516_s4 + $0x18] sm:$0xf0] }
 0x108   :  { %v1423_v25 = vor.u32 %v1760_v24, %v1422_v23  ;;  %v1781_v23 = vld [vmem:[%s2518_s6 + $0x54] sm:$0xf0]  ;;  %v1780_v24 = vld [vmem:[%s2518_s6 + $0x54] sm:$0xf] }
 0x184   :  { %v179_v28 = vpop.f32.mrf.mxu0 }
 0x185   :  { %v188_v29 = vadd.f32 %v186_v27, %v179_v28  ;;  %v194_v32 = vadd.f32 %v192_v30, %v179_v28 }
 0x187   :  { %208 = vrot.lane.b32.xlu2 %v188_v29, %s1880_s25 }
 0x18c   :  { %v181_v31 = vpop.f32.mrf.mxu0 }
 0x18d   :  { %v189_v33 = vadd.f32 %v186_v27, %v181_v31  ;;  %v195_v34 = vadd.f32 %v192_v30, %v181_v31  ;;  %v202_v36 = vrot.slane %v181_v31, 7 }
 0x18f   :  { %210 = vrot.lane.b32.xlu1 %v189_v33, %s1880_s25  ;;  %v1833_v35 = vpack.i.bf16 %v194_v32, %v195_v34  ;;  %v204_v41 = vsel %vm199_vm4, %v179_v28, %v202_v36  ;;  %v41_v36 = vld [vmem:[%s2521_s9 + $0x4] ss:$0 sm:$0xff] }
 0x190   :  { %v205_v44 = vadd.f32 %v204_v41, %v37_v40 }
 0x191   :  { %1834 = vrot.lane.b32.xlu0 %v1833_v35, %s1878_s23  ;;  %s1356_s23 = sshll.u32 %s1883_s22, 4  ;;  %s1357_s23 = int_to_ptr.vmem [resolvable:$true] %s1356_s23 }
 0x199   :  { %289 = vrot.lane.b32.xlu0 %v1413_v13, %s1879_s24 }
 0x1a1   :  { %287 = vrot.lane.b32.xlu0 %v1409_v21, %s1879_s24  ;;  %v1761_v21 = vld [vmem:[%s2516_s4 + $0x38] sm:$0xf0] }
 0x1a2   :  { %v1427_v22 = vor.u32 %v1761_v21, %v1426_v20  ;;  %v1516_v20 = vld [vmem:[%s2518_s6 + $0x68] sm:$0xf0] }
 0x1e1   :  { %v209_v42 = vpop.permute.xlu2 %208 }
 0x201   :  { %v211_v37 = vpop.permute.xlu1 %210 }
 0x202   :  { %1415 = vmatpush.xpose.msk.msra.mxu2 %vm166_vm3, %v211_v37 }
 0x203   :  { %v1835_v38 = vpop.permute.xlu0 %1834 }
 0x204   :  { %v1836_v39 = vunpack.i.l.bf16 %v1835_v38  ;;  %v1837_v43 = vunpack.i.h.bf16 %v1835_v38  ;;  %v42_v38 = vld [vmem:[%s2521_s9 + $0x5] ss:$0 sm:$0xff] }
 0x206   :  { %1416 = vmatpush.xpose.msk.msra.mxu2 %vm166_vm3, %v209_v42  ;;  %280 = vmatpush.msra.mxu3 %v1836_v39  ;;  %v1765_v42 = vld [vmem:[%s2517_s5 + $0x18] sm:$0xff] }
 0x207   :  { %425 = vmatpush.bf16.msra.mxu1 %v1765_v42  ;;  %v1766_v42 = vld [vmem:[%s2516_s4 + $0x8] sm:$0xf] }
 0x208   :  { %281 = vmatpush.msra.mxu3 %v1837_v43  ;;  %v1764_v43 = vld [vmem:[%s2517_s5 + $0x10] sm:$0xff] }
 0x209   :  { %1417 = vmatmul.msk.f32.vlgmr.msra.gmra.mxu2 %vm166_vm3, %v205_v44  ;;  %v1763_v44 = vld [vmem:[%s2517_s5 + $0x8] sm:$0xff] }
 0x20a   :  { %368 = vmatpush.bf16.msrb.mxu2 %v1427_v22  ;;  %v1506_v22 = vld [vmem:[%s2518_s6 + $0x50] sm:$0xf] }
 0x20b   :  { %v290_v55 = vpop.permute.xlu0 %289  ;;  %426 = vmatpush.bf16.msra.mxu1 %v1764_v43 }
 0x20c   :  { %302 = vmatpush.bf16.msrb.mxu3 %v290_v55 }
 0x20e   :  { %369 = vmatpush.bf16.msrb.mxu2 %v1423_v25  ;;  %v1507_v25 = vor.u32 %v1781_v23, %v1506_v22  ;;  %v1530_v23 = vld [vmem:[%s2518_s6 + $0x80] sm:$0xf] }
 0x20f   :  { %427 = vmatpush.bf16.msra.mxu1 %v1763_v44  ;;  %v1450_v44 = vld [vmem:[%s2516_s4 + $0x14] sm:$0xf0] }
 0x213   :  { %v288_v56 = vpop.permute.xlu0 %287 }
 0x214   :  { %303 = vmatpush.bf16.msrb.mxu3 %v288_v56 }
 0x28c   :  { %v236_v45 = vpop.f32.mrf.mxu2 }
 0x28d   :  { %v239_v47 = vmul.f32 0.17677669, %v236_v45  ;;  %v1762_v45 = vld [vmem:[%s2517_s5] sm:$0xff] }
 0x28e   :  { %428 = vmatpush.bf16.msra.mxu1 %v1762_v45  ;;  %v1490_v45 = vld [vmem:[%s2518_s6 + $0x30] sm:$0xf] }
 0x28f   :  { %v241_v48 = vadd.f32 %v240_v46, %v239_v47  ;;  %v45_v46 = vld [vmem:[%s2521_s9 + $0x10] ss:$0 sm:$0xff] }
 0x291   :  { %v243_v49 = vsel %vm242_vm5, %v241_v48, -inf }
 0x292   :  { %244 = vmax.xlane.f32.xlu2 %v243_v49 }
 0x305   :  { %v245_v50 = vpop.xlane.xlu2 %244 }
 0x306   :  { %v246_v51 = vsub.f32 %v241_v48, %v245_v50 }
 0x308   :  { %v247_v52 = vmul.f32 1.442695, %v246_v51 }
 0x30a   :  { %1838 = vpow2.f32 %v247_v52 }
 0x310   :  { %v1839_v53 = vpop.eup %1838 }
 0x311   :  { %v249_v54 = vsel %vm242_vm5, %v1839_v53, 0.0 }
 0x312   :  { %250 = vadd.xlane.f32.xlu1 %v249_v54 }
 0x385   :  { %v251_v57 = vpop.xlane.xlu1 %250 }
 0x386   :  { %1840 = vrcp.f32 %v251_v57 }
 0x387   :  { %1842 = vrcp.f32 %v1881_v6 }
 0x38c   :  { %v1841_v58 = vpop.eup %1840 }
 0x38d   :  { %v253_v59 = vmul.f32 %v1841_v58, %v1839_v53  ;;  %v1843_v7 = vpop.eup %1842 }
 0x38e   :  { %v315_v8 = vmul.f32 32.0, %v1843_v7  ;;  %vm319_vm8 = vweird.f32 %v1843_v7 }
 0x38f   :  { %1418 = vmatmul.msk.f32.vlgmr.msra.gmra.mxu3 %vm262_vm6, %v253_v59 }
 0x390   :  { %v316_v9 = vsub.f32 1.0, %v315_v8  ;;  %v1785_v8 = vld [vmem:[%s2518_s6 + $0x74] sm:$0xf0] }
 0x392   :  { %v317_v10 = vmul.f32 %v1843_v7, %v316_v9  ;;  %v1784_v9 = vld [vmem:[%s2518_s6 + $0x74] sm:$0xf] }
 0x394   :  { %v318_v11 = vadd.f32 %v1843_v7, %v317_v10 }
 0x396   :  { %v2018_v12 = vsel %vm319_vm8, %v1843_v7, %v318_v11  ;;  %v1522_v7 = vld [vmem:[%s2518_s6 + $0x70] sm:$0xf]  ;;  %v1524_v11 = vld [vmem:[%s2518_s6 + $0x78] sm:$0xf0] }
 0x397   :  { %v1523_v10 = vor.u32 %v1785_v8, %v1522_v7  ;;  %v1789_v8 = vld [vmem:[%s2518_s6 + $0x94] sm:$0xf0] }
 0x399   :  { %674 = vmatpush.bf16.msrb.mxu1 %v1523_v10  ;;  %v1540_v10 = vld [vmem:[%s2518_s6 + $0x98] sm:$0xf0] }
 0x412   :  { %v283_v60 = vpop.f32.mrf.mxu3 }
 0x413   :  { %v286_v61 = vpack.c.bf16 %v283_v60, %v283_v60  ;;  %v46_v60 = vld [vmem:[%s2521_s9 + $0x11] ss:$0 sm:$0xff] }
 0x415   :  { %1419 = vmatmul.msk.bf16.vlgmr.msrb.gmra.mxu3 %vm166_vm3, %v286_v61 }
 0x498   :  { %v305_v0 = vpop.f32.mrf.mxu3 }
 0x499   :  { %v306_v1 = vadd.f32 %v305_v0, %v40_v63 }
 0x49b   :  { %v309_v3 = vadd.f32 %v306_v1, %v200_v2 }
 0x49d   :  { %v311_v4 = vsel %vm310_vm7, %v309_v3, 0.0 }
 0x49e   :  { %312 = vadd.xlane.f32.xlu0 %v311_v4 }
 0x4a0   :  { %v307_v5 = vpop.f32.mrf.mxu3 }
 0x511   :  { %v313_v13 = vpop.xlane.xlu0 %312 }
 0x512   :  { %v321_v14 = vmul.f32 %v2018_v12, %v313_v13  ;;  %v1527_v13 = vor.u32 %v1784_v9, %v1524_v11  ;;  %v1788_v9 = vld [vmem:[%s2518_s6 + $0x94] sm:$0xf] }
 0x513   :  { %v1543_v22 = vor.u32 %v1788_v9, %v1540_v10 }
 0x514   :  { %v322_v17 = vsub.f32 %v309_v3, %v321_v14  ;;  %712 = vmatpush.bf16.msra.mxu0 %v1527_v13  ;;  %v1514_v14 = vld [vmem:[%s2518_s6 + $0x60] sm:$0xf]  ;;  %v1771_v13 = vld [vmem:[%s2518_s6 + $0x4] sm:$0xf0] }
 0x516   :  { %v323_v18 = vmul.f32 %v322_v17, %v322_v17 }
 0x518   :  { %v324_v19 = vsel %vm310_vm7, %v323_v18, 0.0  ;;  %v1782_v18 = vld [vmem:[%s2518_s6 + $0x64] sm:$0xf] }
 0x519   :  { %325 = vadd.xlane.f32.xlu2 %v324_v19  ;;  %v1519_v21 = vor.u32 %v1782_v18, %v1516_v20  ;;  %v1468_v20 = vld [vmem:[%s2518_s6 + $0x8] sm:$0xf0] }
 0x51b   :  { %713 = vmatpush.bf16.msra.mxu0 %v1519_v21 }
 0x58c   :  { %v326_v26 = vpop.xlane.xlu2 %325 }
 0x58d   :  { %v327_v27 = vmul.f32 %v326_v26, %v2018_v12  ;;  %v1508_v26 = vld [vmem:[%s2518_s6 + $0x58] sm:$0xf0] }
 0x58f   :  { %v328_v28 = vadd.f32 1e-12, %v327_v27  ;;  %v1511_v27 = vor.u32 %v1780_v24, %v1508_v26  ;;  %v1786_v26 = vld [vmem:[%s2518_s6 + $0x84] sm:$0xf] }
 0x591   :  { %1844 = vrsqrt.f32 %v328_v28  ;;  %vm335_vm10 = vweird.f32 %v328_v28  ;;  %714 = vmatpush.bf16.msra.mxu0 %v1511_v27  ;;  %v1532_v27 = vld [vmem:[%s2518_s6 + $0x88] sm:$0xf0] }
 0x597   :  { %v1845_v29 = vpop.eup %1844 }
 0x598   :  { %v330_v30 = vmul.f32 %v1845_v29, %v328_v28  ;;  %vm336_vm9 = vweird.f32 %v1845_v29  ;;  %v1456_v28 = vld [vmem:[%s2516_s4 + $0x24] sm:$0xf] }
 0x599   :  { %vm337_vm11 = vmor %vm335_vm10, %vm336_vm9 }
 0x59a   :  { %v331_v31 = vmul.f32 %v1845_v29, %v330_v30  ;;  %v1768_v30 = vld [vmem:[%s2516_s4 + $0x28] sm:$0xf] }
 0x59c   :  { %v332_v32 = vmul.f32 0.5, %v331_v31 }
 0x59e   :  { %v333_v33 = vsub.f32 1.5, %v332_v32  ;;  %v1458_v32 = vld [vmem:[%s2516_s4 + $0x34] sm:$0xf0] }
 0x5a0   :  { %v334_v34 = vmul.f32 %v1845_v29, %v333_v33  ;;  %v1498_v33 = vld [vmem:[%s2518_s6 + $0x40] sm:$0xf] }
 0x5a2   :  { %v338_v35 = vsel %vm337_vm11, %v1845_v29, %v334_v34  ;;  %v1769_v29 = vld [vmem:[%s2516_s4 + $0x30] sm:$0xf0]  ;;  %v1779_v34 = vld [vmem:[%s2518_s6 + $0x44] sm:$0xf0] }
 0x5a3   :  { %v339_v37 = vmul.f32 %v338_v35, %v322_v17  ;;  %v1783_v17 = vld [vmem:[%s2518_s6 + $0x64] sm:$0xf0]  ;;  %v1457_v31 = vor.u32 %v1769_v29, %v1456_v28  ;;  %v1461_v35 = vor.u32 %v1768_v30, %v1458_v32  ;;  %v518_v29 = vld [vmem:[%s2514_s2] sm:$0xff]  ;;  %v520_v30 = vld [vmem:[%s2514_s2 + $0x10] sm:$0xff]  ;;  %v1535_v32 = vor.u32 %v1786_v26, %v1532_v27 }
 0x5a4   :  { %v1515_v19 = vor.u32 %v1783_v17, %v1514_v14  ;;  %v1770_v14 = vld [vmem:[%s2518_s6 + $0x4] sm:$0xf] }
 0x5a5   :  { %v340_v39 = vmul.f32 %v339_v37, %v41_v36  ;;  %v1499_v36 = vor.u32 %v1779_v34, %v1498_v33  ;;  %v1778_v37 = vld [vmem:[%s2518_s6 + $0x44] sm:$0xf]  ;;  %498 = vmatpush.bf16.msra.mxu3 %v1457_v31  ;;  %511 = vmatpush.bf16.msra.mxu2 %v1461_v35  ;;  %v1471_v28 = vor.u32 %v1770_v14, %v1468_v20 }
 0x5a6   :  { %675 = vmatpush.bf16.msrb.mxu1 %v1515_v19  ;;  %v526_v33 = vpack.c.bf16 %v520_v30, %v518_v29 }
 0x5a7   :  { %v341_v40 = vadd.f32 %v340_v39, %v42_v38  ;;  %v1500_v38 = vld [vmem:[%s2518_s6 + $0x48] sm:$0xf0] }
 0x5a8   :  { %v1503_v39 = vor.u32 %v1778_v37, %v1500_v38 }
 0x5a9   :  { %v342_v41 = vpack.c.bf16 %v341_v40, %v341_v40 }
 0x5aa   :  { %676 = vmatpush.bf16.msrb.mxu1 %v1507_v25  ;;  %715 = vmatpush.bf16.msra.mxu0 %v1503_v39  ;;  %v1787_v25 = vld [vmem:[%s2518_s6 + $0x84] sm:$0xf0] }
 0x5ab   :  { %1428 = vmatmul.msk.bf16.vlgmr.msrb.gmra.mxu2 %vm166_vm3, %v342_v41  ;;  %v1767_v41 = vld [vmem:[%s2516_s4 + $0x10] sm:$0xf0]  ;;  %v1531_v31 = vor.u32 %v1787_v25, %v1530_v23 }
 0x5ae   :  { %677 = vmatpush.bf16.msrb.mxu1 %v1499_v36 }
 0x62e   :  { %v371_v47 = vpop.f32.mrf.mxu2 }
 0x62f   :  { %v372_v48 = vadd.f32 %v371_v47, %v45_v46  ;;  %v1777_v46 = vld [vmem:[%s2518_s6 + $0x34] sm:$0xf0]  ;;  %v1453_v47 = vor.u32 %v1766_v42, %v1450_v44  ;;  %v522_v42 = vld [vmem:[%s2514_s2 + $0x20] sm:$0xff] }
 0x631   :  { %v375_v49 = vmul.f32 %v372_v48, %v372_v48  ;;  %512 = vmatpush.bf16.msra.mxu2 %v1453_v47 }
 0x633   :  { %v376_v50 = vmul.f32 %v375_v49, %v372_v48  ;;  %v1776_v49 = vld [vmem:[%s2518_s6 + $0x34] sm:$0xf] }
 0x635   :  { %v377_v51 = vmul.f32 0.044715, %v376_v50  ;;  %v1492_v50 = vld [vmem:[%s2518_s6 + $0x38] sm:$0xf0] }
 0x636   :  { %v373_v52 = vpop.f32.mrf.mxu2 }
 0x637   :  { %v378_v53 = vadd.f32 %v377_v51, %v372_v48  ;;  %v1495_v51 = vor.u32 %v1776_v49, %v1492_v50  ;;  %v1482_v52 = vld [vmem:[%s2518_s6 + $0x20] sm:$0xf]  ;;  %v519_v50 = vld [vmem:[%s2514_s2 + $0x8] sm:$0xff] }
 0x639   :  { %v379_v54 = vmul.f32 0.7978846, %v378_v53  ;;  %v1775_v53 = vld [vmem:[%s2518_s6 + $0x24] sm:$0xf0]  ;;  %716 = vmatpush.bf16.msra.mxu0 %v1495_v51 }
 0x63b   :  { %1846 = vtanh.f32 %v379_v54  ;;  %v1774_v54 = vld [vmem:[%s2518_s6 + $0x24] sm:$0xf] }
 0x641   :  { %v1847_v55 = vpop.eup %1846 }
 0x642   :  { %v381_v56 = vadd.f32 1.0, %v1847_v55  ;;  %v550_v55 = vld [vmem:[%s2518_s6 + $0xa0] sm:$0x11] }
 0x644   :  { %v382_v57 = vmul.f32 0.5, %v381_v56  ;;  %v1483_v56 = vor.u32 %v1775_v53, %v1482_v52  ;;  %v523_v52 = vld [vmem:[%s2514_s2 + $0x28] sm:$0xff]  ;;  %v525_v53 = vld [vmem:[%s2514_s2 + $0x38] sm:$0xff] }
 0x646   :  { %v383_v58 = vmul.f32 %v382_v57, %v372_v48  ;;  %v1491_v48 = vor.u32 %v1777_v46, %v1490_v45  ;;  %v1484_v57 = vld [vmem:[%s2518_s6 + $0x28] sm:$0xf0]  ;;  %v44_v45 = vld [vmem:[%s2521_s9 + $0x7] ss:$0 sm:$0xff] }
 0x648   :  { %v384_v59 = vpack.c.bf16 %v383_v58, %v383_v58  ;;  %678 = vmatpush.bf16.msrb.mxu1 %v1491_v48  ;;  %v617_v58 = vunpack.c.l.b16 %v550_v55 }
 0x64a   :  { %1445 = vmatmul.msk.bf16.vlgmr.msra.gmra.mxu1 %vm417_vm12, %v384_v59  ;;  %v618_v59 = vunpack.c.h.b16 %v550_v55  ;;  %v2251_v55 = vshrl.u32 %v56_v15, 7 }
 0x64c   :  { %679 = vmatpush.bf16.msrb.mxu1 %v1483_v56  ;;  %v804_v56 = vadd.s32 120, %v2251_v55  ;;  %v797_v26 = vadd.s32 64, %v2251_v55 }
 0x6c7   :  { %v430_v61 = vpop.f32.mrf.mxu1 }
 0x6c8   :  { %v431_v62 = vadd.f32 %v430_v61, %v46_v60  ;;  %v1487_v60 = vor.u32 %v1774_v54, %v1484_v57  ;;  %v1474_v61 = vld [vmem:[%s2518_s6 + $0x10] sm:$0xf]  ;;  %v529_v54 = vpack.c.bf16 %v525_v53, %v523_v52  ;;  %v820_v57 = vadd.s32 248, %v2251_v55 }
 0x6c9   :  { %v792_v53 = vadd.s32 24, %v2251_v55 }
 0x6ca   :  { %v434_v63 = vadd.f32 %v431_v62, %v341_v40  ;;  %v1448_v40 = vld [vmem:[%s2516_s4 + $0x4] sm:$0xf]  ;;  %v1773_v62 = vld [vmem:[%s2518_s6 + $0x14] sm:$0xf0]  ;;  %717 = vmatpush.bf16.msra.mxu0 %v1487_v60  ;;  %v803_v60 = vadd.s32 112, %v2251_v55 }
 0x6cb   :  { %v1449_v43 = vor.u32 %v1767_v41, %v1448_v40  ;;  %v1475_v7 = vor.u32 %v1773_v62, %v1474_v61  ;;  %v43_v40 = vld [vmem:[%s2521_s9 + $0x6] ss:$0 sm:$0xff]  ;;  %v819_v61 = vadd.s32 240, %v2251_v55 }
 0x6cc   :  { %v435_v0 = vsel %vm310_vm7, %v434_v63, 0.0  ;;  %v835_v62 = vand.u32 15, %v803_v60  ;;  %v824_v60 = vand.u32 15, %v792_v53 }
 0x6cd   :  { %436 = vadd.xlane.f32.xlu2 %v435_v0  ;;  %499 = vmatpush.bf16.msra.mxu3 %v1449_v43  ;;  %v524_v43 = vld [vmem:[%s2514_s2 + $0x30] sm:$0xff]  ;;  %v851_v15 = vand.u32 15, %v819_v61 }
 0x6ce   :  { %680 = vmatpush.bf16.msrb.mxu1 %v1475_v7  ;;  %v528_v47 = vpack.c.bf16 %v524_v43, %v522_v42  ;;  %v810_v42 = vadd.s32 168, %v2251_v55  ;;  %v1367_v43 = vld [vmem:[%s2521_s9 + $0x12] ss:$8 sm:$0x3] }
 0x6cf   :  { %v432_v1 = vpop.f32.mrf.mxu1  ;;  %vm883_vm5 = vcmp.eq.s32.totalorder %v851_v15, %v1976_v16  ;;  %v807_v15 = vadd.s32 144, %v2251_v55 }
 0x6d0   :  { %v1476_v1 = vld [vmem:[%s2518_s6 + $0x18] sm:$0xf0] }
 0x740   :  { %v437_v2 = vpop.xlane.xlu2 %436 }
 0x741   :  { %v438_v3 = vmul.f32 %v437_v2, %v2018_v12  ;;  %v1538_v2 = vld [vmem:[%s2518_s6 + $0x90] sm:$0xf] }
 0x742   :  { %v1539_v21 = vor.u32 %v1789_v8, %v1538_v2  ;;  %v801_v2 = vadd.s32 96, %v2251_v55 }
 0x743   :  { %v2062_v4 = vsub.f32 %v434_v63, %v438_v3  ;;  %v1772_v63 = vld [vmem:[%s2518_s6 + $0x14] sm:$0xf] }
 0x744   :  { %v1479_v11 = vor.u32 %v1772_v63, %v1476_v1  ;;  %v1882_v63 = vmov 1.0   ;;  %v818_v1 = vadd.s32 232, %v2251_v55  ;;  %v833_v9 = vand.u32 15, %v801_v2 }
 0x745   :  { %v440_v5 = vmul.f32 %v2062_v4, %v2062_v4 }
 0x746   :  { %718 = vmatpush.bf16.msra.mxu0 %v1479_v11  ;;  %v800_v11 = vadd.s32 88, %v2251_v55  ;;  %vm865_vm9 = vcmp.eq.s32.totalorder %v833_v9, %v1976_v16 }
 0x747   :  { %v441_v6 = vsel %vm310_vm7, %v440_v5, 0.0  ;;  %v639_v5 = vpack.c.b16 %v617_v58, %v617_v58  ;;  %v836_v58 = vand.u32 15, %v804_v56  ;;  %v2338_v56 = vperm.slane %v1367_v43, 0 }
 0x748   :  { %442 = vadd.xlane.f32.xlu1 %v441_v6  ;;  %v640_v6 = vpack.c.b16 %v618_v59, %v618_v59  ;;  %v852_v59 = vand.u32 15, %v820_v57  ;;  %v2340_v57 = vperm.slane %v1367_v43, 1 }
 0x749   :  { %v669_v18 = vsel %vm199_vm4, %v639_v5, 0  ;;  %vm868_vm1 = vcmp.eq.s32.totalorder %v836_v58, %v1976_v16 }
 0x74a   :  { %v672_v19 = vsel %vm199_vm4, %v640_v6, 0  ;;  %698 = vmatpush.bf16.msrb.mxu3 %v669_v18  ;;  %719 = vmatpush.bf16.msra.mxu0 %v1471_v28  ;;  %vm884_vm2 = vcmp.eq.s32.totalorder %v852_v59, %v1976_v16  ;;  %v850_v6 = vand.u32 15, %v818_v1  ;;  %v815_v18 = vadd.s32 208, %v2251_v55 }
 0x74b   :  { %736 = vmatpush.bf16.msrb.mxu2 %v672_v19  ;;  %v798_v19 = vadd.s32 72, %v2251_v55  ;;  %v813_v28 = vadd.s32 192, %v2251_v55  ;;  %v839_v1 = vand.u32 15, %v807_v15 }
 0x74c   :  { %vm882_vm8 = vcmp.eq.s32.totalorder %v850_v6, %v1976_v16  ;;  %v806_v6 = vadd.s32 136, %v2251_v55 }
 0x74d   :  { %720 = vmatmul.bf16.vlgmr.msra.gmra.mxu0 %v526_v33  ;;  %v830_v25 = vand.u32 15, %v798_v19 }
 0x74e   :  { %699 = vmatpush.bf16.msrb.mxu3 %v1539_v21 }
 0x74f   :  { %737 = vmatpush.bf16.msrb.mxu2 %v1543_v22  ;;  %v814_v22 = vadd.s32 200, %v2251_v55 }
 0x751   :  { %v846_v27 = vand.u32 15, %v814_v22 }
 0x752   :  { %700 = vmatpush.bf16.msrb.mxu3 %v1531_v31  ;;  %v829_v31 = vand.u32 15, %v797_v26  ;;  %v1616_v26 = vld [vmem:[%s2519_s7 + $0x8] sm:$0xf0] }
 0x753   :  { %738 = vmatpush.bf16.msrb.mxu2 %v1535_v32  ;;  %v845_v32 = vand.u32 15, %v813_v28 }
 0x75d   :  { %725 = vmatmul.bf16.gmra.mxu0 %v528_v47 }
 0x7bb   :  { %v443_v0 = vpop.xlane.xlu1 %442 }
 0x7bc   :  { %v444_v3 = vmul.f32 %v443_v0, %v2018_v12  ;;  %v1466_v12 = vld [vmem:[%s2518_s6] sm:$0xf]  ;;  %v802_v0 = vadd.s32 104, %v2251_v55 }
 0x7bd   :  { %v1467_v24 = vor.u32 %v1771_v13, %v1466_v12  ;;  %v816_v12 = vadd.s32 216, %v2251_v55  ;;  %v832_v13 = vand.u32 15, %v800_v11 }
 0x7be   :  { %v445_v17 = vadd.f32 1e-12, %v444_v3  ;;  %v817_v3 = vadd.s32 224, %v2251_v55  ;;  %v834_v5 = vand.u32 15, %v802_v0 }
 0x7bf   :  { %681 = vmatpush.bf16.msrb.mxu1 %v1467_v24  ;;  %v848_v14 = vand.u32 15, %v816_v12  ;;  %vm864_vm11 = vcmp.eq.s32.totalorder %v832_v13, %v1976_v16  ;;  %v847_v24 = vand.u32 15, %v815_v18  ;;  %v838_v13 = vand.u32 15, %v806_v6 }
 0x7c0   :  { %1848 = vrsqrt.f32 %v445_v17  ;;  %vm452_vm14 = vweird.f32 %v445_v17  ;;  %v849_v10 = vand.u32 15, %v817_v3  ;;  %vm866_vm7 = vcmp.eq.s32.totalorder %v834_v5, %v1976_v16 }
 0x7c1   :  { %vm880_vm12 = vcmp.eq.s32.totalorder %v848_v14, %v1976_v16  ;;  %v790_v5 = vadd.s32 8, %v2251_v55  ;;  %v821_v14 = vand.u32 15, %v2251_v55 }
 0x7c2   :  { %682 = vmatmul.bf16.vlgmr.msrb.gmra.mxu1 %v526_v33  ;;  %vm881_vm10 = vcmp.eq.s32.totalorder %v849_v10, %v1976_v16  ;;  %v796_v33 = vadd.s32 56, %v2251_v55  ;;  %v805_v10 = vadd.s32 128, %v2251_v55 }
 0x7c3   :  { %v822_v12 = vand.u32 15, %v790_v5 }
 0x7c4   :  { %v837_v19 = vand.u32 15, %v805_v10 }
 0x7c6   :  { %v1849_v34 = vpop.eup %1848 }
 0x7c7   :  { %v447_v35 = vmul.f32 %v1849_v34, %v445_v17  ;;  %vm453_vm13 = vweird.f32 %v1849_v34  ;;  %v799_v17 = vadd.s32 80, %v2251_v55 }
 0x7c8   :  { %vm454_vm15 = vmor %vm452_vm14, %vm453_vm13  ;;  %vm879_vm14 = vcmp.eq.s32.totalorder %v847_v24, %v1976_v16 }
 0x7c9   :  { %v448_v36 = vmul.f32 %v1849_v34, %v447_v35  ;;  %v831_v23 = vand.u32 15, %v799_v17  ;;  %v795_v35 = vadd.s32 48, %v2251_v55 }
 0x7ca   :  { %v2289_v21 = vpop.f32.mrf.mxu0 }
 0x7cb   :  { %v449_v37 = vmul.f32 0.5, %v448_v36  ;;  %vm863_vm13 = vcmp.eq.s32.totalorder %v831_v23, %v1976_v16  ;;  %v811_v36 = vadd.s32 176, %v2251_v55  ;;  %v722_v3 = vadd.f32 %v2289_v21, %v2340_v57 }
 0x7cd   :  { %v450_v38 = vsub.f32 1.5, %v449_v37  ;;  %v828_v37 = vand.u32 15, %v796_v33 }
 0x7cf   :  { %v451_v39 = vmul.f32 %v1849_v34, %v450_v38 }
 0x7d1   :  { %v455_v41 = vsel %vm454_vm15, %v1849_v34, %v451_v39  ;;  %vm862_vm15 = vcmp.eq.s32.totalorder %v830_v25, %v1976_v16  ;;  %v812_v34 = vadd.s32 184, %v2251_v55  ;;  %v827_v39 = vand.u32 15, %v795_v35  ;;  %v1790_v25 = vld [vmem:[%s2519_s7 + $0x4] sm:$0xf] }
 0x7d2   :  { %v456_v44 = vmul.f32 %v455_v41, %v2062_v4  ;;  %687 = vmatmul.bf16.gmra.mxu1 %v528_v47  ;;  %v521_v4 = vld [vmem:[%s2514_s2 + $0x18] sm:$0xff]  ;;  %v794_v41 = vadd.s32 40, %v2251_v55  ;;  %v842_v47 = vand.u32 15, %v810_v42 }
 0x7d3   :  { %v527_v51 = vpack.c.bf16 %v521_v4, %v519_v50  ;;  %v844_v38 = vand.u32 15, %v812_v34  ;;  %v793_v50 = vadd.s32 32, %v2251_v55  ;;  %v809_v4 = vadd.s32 160, %v2251_v55 }
 0x7d4   :  { %v457_v46 = vmul.f32 %v456_v44, %v43_v40  ;;  %v843_v40 = vand.u32 15, %v811_v36 }
 0x7d5   :  { %v825_v58 = vand.u32 15, %v793_v50  ;;  %v841_v59 = vand.u32 15, %v809_v4 }
 0x7d6   :  { %v458_v48 = vadd.f32 %v457_v46, %v44_v45  ;;  %v826_v46 = vand.u32 15, %v794_v41  ;;  %v1805_v45 = vld [vmem:[%s2520_s8 + $0x68] sm:$0xff] }
 0x7d8   :  { %v459_v49 = vpack.c.bf16 %v458_v48, %v458_v48 }
 0x7da   :  { %1462 = vmatmul.msk.bf16.vlgmr.msra.gmra.mxu3 %vm166_vm3, %v459_v49  ;;  %1463 = vmatmul.msk.bf16.vlgmr.msra.gmra.mxu2 %vm166_vm3, %v459_v49  ;;  %vm867_vm3 = vcmp.eq.s32.totalorder %v835_v62, %v1976_v16  ;;  %v723_v49 = vpop.f32.mrf.mxu0  ;;  %v791_v62 = vadd.s32 16, %v2251_v55 }
 0x7db   :  { %1580 = vmatpush.msk.msra.mxu3 %vm868_vm1, %v1882_v63  ;;  %1596 = vmatpush.msk.msra.mxu2 %vm884_vm2, %v1882_v63  ;;  %vm861_vm1 = vcmp.eq.s32.totalorder %v829_v31, %v1976_v16  ;;  %vm877_vm2 = vcmp.eq.s32.totalorder %v845_v32, %v1976_v16  ;;  %v724_v11 = vadd.f32 %v723_v49, %v2340_v57  ;;  %v1807_v31 = vld [vmem:[%s2520_s8 + $0x78] sm:$0xff] }
 0x7dc   :  { %v823_v0 = vand.u32 15, %v791_v62 }
 0x7dd   :  { %1581 = vmatpush.msk.msra.mxu3 %vm867_vm3, %v1882_v63  ;;  %1597 = vmatpush.msk.msra.mxu2 %vm883_vm5, %v1882_v63  ;;  %vm860_vm3 = vcmp.eq.s32.totalorder %v828_v37, %v1976_v16  ;;  %vm876_vm5 = vcmp.eq.s32.totalorder %v844_v38, %v1976_v16 }
 0x7df   :  { %1582 = vmatpush.msk.msra.mxu3 %vm866_vm7, %v1882_v63  ;;  %1598 = vmatpush.msk.msra.mxu2 %vm882_vm8, %v1882_v63  ;;  %vm2321_vm7 = vcmp.eq.s32.totalorder %v827_v39, %v1976_v16  ;;  %vm2326_vm8 = vcmp.eq.s32.totalorder %v843_v40, %v1976_v16 }
 0x7e1   :  { %1583 = vmatpush.msk.msra.mxu3 %vm865_vm9, %v1882_v63  ;;  %1599 = vmatpush.msk.msra.mxu2 %vm881_vm10, %v1882_v63  ;;  %vm858_vm9 = vcmp.eq.s32.totalorder %v826_v46, %v1976_v16  ;;  %vm874_vm10 = vcmp.eq.s32.totalorder %v842_v47, %v1976_v16 }
 0x7e2   :  { %v726_v23 = vpop.f32.mrf.mxu0 }
 0x7e3   :  { %1584 = vmatpush.msk.msra.mxu3 %vm864_vm11, %v1882_v63  ;;  %1600 = vmatpush.msk.msra.mxu2 %vm880_vm12, %v1882_v63  ;;  %vm857_vm11 = vcmp.eq.s32.totalorder %v825_v58, %v1976_v16  ;;  %vm873_vm12 = vcmp.eq.s32.totalorder %v841_v59, %v1976_v16  ;;  %v727_v40 = vadd.f32 %v726_v23, %v2340_v57  ;;  %v1799_v23 = vld [vmem:[%s2520_s8 + $0x38] sm:$0xff] }
 0x7e5   :  { %1585 = vmatpush.msk.msra.mxu3 %vm863_vm13, %v1882_v63  ;;  %1601 = vmatpush.msk.msra.mxu2 %vm879_vm14, %v1882_v63  ;;  %vm856_vm13 = vcmp.eq.s32.totalorder %v824_v60, %v1976_v16 }
 0x7e7   :  { %1586 = vmatpush.msk.msra.mxu3 %vm862_vm15, %v1882_v63  ;;  %vm855_vm15 = vcmp.eq.s32.totalorder %v823_v0, %v1976_v16 }
 0x7e9   :  { %1587 = vmatpush.msk.msra.mxu3 %vm861_vm1, %v1882_v63  ;;  %vm854_vm1 = vcmp.eq.s32.totalorder %v822_v12, %v1976_v16 }
 0x7ea   :  { %1544 = vmatmul.msk.bf16.vlgmr.msrb.gmra.mxu3 %vm661_vm0, %v527_v51  ;;  %1546 = vmatmul.msk.bf16.vlgmr.msrb.gmra.mxu2 %vm661_vm0, %v527_v51  ;;  %v728_v42 = vpop.f32.mrf.mxu0 }
 0x7eb   :  { %1588 = vmatpush.msk.msra.mxu3 %vm860_vm3, %v1882_v63  ;;  %vm853_vm3 = vcmp.eq.s32.totalorder %v821_v14, %v1976_v16  ;;  %v729_v47 = vadd.f32 %v728_v42, %v2340_v57  ;;  %v1812_v42 = vld [vmem:[%s2520_s8 + $0xa0] sm:$0xff] }
 0x7ed   :  { %1589 = vmatpush.msk.msra.mxu3 %vm2321_vm7, %v1882_v63 }
 0x7ef   :  { %1590 = vmatpush.msk.msra.mxu3 %vm858_vm9, %v1882_v63 }
 0x7f1   :  { %1591 = vmatpush.msk.msra.mxu3 %vm857_vm11, %v1882_v63 }
 0x7f3   :  { %1592 = vmatpush.msk.msra.mxu3 %vm856_vm13, %v1882_v63 }
 0x7f5   :  { %1593 = vmatpush.msk.msra.mxu3 %vm855_vm15, %v1882_v63 }
 0x7f7   :  { %1594 = vmatpush.msk.msra.mxu3 %vm854_vm1, %v1882_v63 }
 0x7f9   :  { %1595 = vmatpush.msk.msra.mxu3 %vm853_vm3, %v1882_v63 }
 0x7fa   :  { %1545 = vmatmul.msk.bf16.gmra.mxu3 %vm661_vm0, %v529_v54  ;;  %1547 = vmatmul.msk.bf16.gmra.mxu2 %vm661_vm0, %v529_v54  ;;  %vm878_vm0 = vcmp.eq.s32.totalorder %v846_v27, %v1976_v16  ;;  %v808_v54 = vadd.s32 152, %v2251_v55  ;;  %v1614_v27 = vld [vmem:[%s2519_s7] sm:$0xf] }
 0x7fb   :  { %1602 = vmatpush.msk.msra.mxu2 %vm878_vm0, %v1882_v63  ;;  %vm871_vm0 = vcmp.eq.s32.totalorder %v839_v1, %v1976_v16 }
 0x7fc   :  { %v840_v61 = vand.u32 15, %v808_v54 }
 0x7fd   :  { %1603 = vmatpush.msk.msra.mxu2 %vm877_vm2, %v1882_v63  ;;  %vm870_vm2 = vcmp.eq.s32.totalorder %v838_v13, %v1976_v16 }
 0x7fe   :  { %vm872_vm14 = vcmp.eq.s32.totalorder %v840_v61, %v1976_v16 }
 0x7ff   :  { %1604 = vmatpush.msk.msra.mxu2 %vm876_vm5, %v1882_v63  ;;  %vm869_vm5 = vcmp.eq.s32.totalorder %v837_v19, %v1976_v16 }
 0x801   :  { %1605 = vmatpush.msk.msra.mxu2 %vm2326_vm8, %v1882_v63 }
 0x803   :  { %1606 = vmatpush.msk.msra.mxu2 %vm874_vm10, %v1882_v63 }
 0x805   :  { %1607 = vmatpush.msk.msra.mxu2 %vm873_vm12, %v1882_v63 }
 0x807   :  { %1608 = vmatpush.msk.msra.mxu2 %vm872_vm14, %v1882_v63 }
 0x809   :  { %1609 = vmatpush.msk.msra.mxu2 %vm871_vm0, %v1882_v63 }
 0x80b   :  { %1610 = vmatpush.msk.msra.mxu2 %vm870_vm2, %v1882_v63 }
 0x80d   :  { %1611 = vmatpush.msk.msra.mxu2 %vm869_vm5, %v1882_v63  ;;  %v1806_v63 = vld [vmem:[%s2520_s8 + $0x70] sm:$0xff] }
 0x83f   :  { %v2287_v20 = vpop.f32.mrf.mxu1 }
 0x840   :  { %v684_v2 = vadd.f32 %v2287_v20, %v2338_v56 }
 0x847   :  { %v685_v48 = vpop.f32.mrf.mxu1 }
 0x848   :  { %v686_v9 = vadd.f32 %v685_v48, %v2338_v56 }
 0x84f   :  { %v688_v22 = vpop.f32.mrf.mxu1 }
 0x850   :  { %v689_v39 = vadd.f32 %v688_v22, %v2338_v56 }
 0x857   :  { %v690_v41 = vpop.f32.mrf.mxu1 }
 0x858   :  { %v691_v46 = vadd.f32 %v690_v41, %v2338_v56  ;;  %v1820_v41 = vld [vmem:[%s2520_s8 + $0xe0] sm:$0xff] }
 0x85d   :  { %v2268_v7 = vpop.f32.mrf.mxu3  ;;  %v2270_v8 = vpop.f32.mrf.mxu2 }
 0x865   :  { %v503_v29 = vpop.f32.mrf.mxu3  ;;  %v516_v30 = vpop.f32.mrf.mxu2 }
 0x866   :  { %v1619_v29 = vor.u32 %v1790_v25, %v1616_v26  ;;  %v1791_v30 = vld [vmem:[%s2519_s7 + $0x4] sm:$0xf0]  ;;  %v1798_v25 = vld [vmem:[%s2520_s8 + $0x30] sm:$0xff] }
 0x867   :  { %v1615_v32 = vor.u32 %v1791_v30, %v1614_v27  ;;  %v1797_v26 = vld [vmem:[%s2520_s8 + $0x28] sm:$0xff]  ;;  %v1796_v27 = vld [vmem:[%s2520_s8 + $0x20] sm:$0xff]  ;;  %v1794_v30 = vld [vmem:[%s2520_s8 + $0x10] sm:$0xff] }
 0x868   :  { %1030 = vmatpush.bf16.msra.mxu1 %v1619_v29  ;;  %v1803_v29 = vld [vmem:[%s2520_s8 + $0x58] sm:$0xff] }
 0x869   :  { %1017 = vmatpush.bf16.msrb.mxu3 %v1615_v32  ;;  %v1793_v32 = vld [vmem:[%s2520_s8 + $0x8] sm:$0xff] }
 0x86c   :  { %1335 = vmatpush.bf16.msrb.mxu1 %v1807_v31  ;;  %v1802_v31 = vld [vmem:[%s2520_s8 + $0x50] sm:$0xff] }
 0x86d   :  { %v702_v51 = vpop.f32.mrf.mxu3  ;;  %v740_v52 = vpop.f32.mrf.mxu2 }
 0x86e   :  { %v703_v55 = vadd.f32 %v702_v51, %v684_v2  ;;  %v741_v24 = vadd.f32 %v740_v52, %v722_v3 }
 0x870   :  { %v750_v33 = vmax.f32 %v703_v55, 0.0  ;;  %v751_v34 = vmax.f32 %v741_v24, 0.0  ;;  %1336 = vmatpush.bf16.msrb.mxu1 %v1806_v63  ;;  %v1814_v63 = vld [vmem:[%s2520_s8 + $0xb0] sm:$0xff] }
 0x874   :  { %1337 = vmatpush.bf16.msrb.mxu1 %v1805_v45 }
 0x875   :  { %v704_v17 = vpop.f32.mrf.mxu3  ;;  %v742_v18 = vpop.f32.mrf.mxu2 }
 0x876   :  { %v705_v20 = vadd.f32 %v704_v17, %v686_v9  ;;  %v743_v21 = vadd.f32 %v742_v18, %v724_v11 }
 0x878   :  { %v752_v28 = vmax.f32 %v705_v20, 0.0  ;;  %v753_v16 = vmax.f32 %v743_v21, 0.0 }
 0x87a   :  { %v758_v37 = vadd.f32 %v752_v28, %v750_v33  ;;  %v765_v38 = vadd.f32 %v753_v16, %v751_v34  ;;  %v1804_v28 = vld [vmem:[%s2520_s8 + $0x60] sm:$0xff]  ;;  %v1795_v16 = vld [vmem:[%s2520_s8 + $0x18] sm:$0xff]  ;;  %v1801_v33 = vld [vmem:[%s2520_s8 + $0x48] sm:$0xff] }
 0x87b   :  { %1338 = vmatpush.bf16.msrb.mxu1 %v1804_v28  ;;  %v1792_v34 = vld [vmem:[%s2520_s8] sm:$0xff] }
 0x87c   :  { %v759_v43 = vrot.slane %v758_v37, 4  ;;  %v766_v44 = vrot.slane %v765_v38, 4 }
 0x87d   :  { %v707_v35 = vpop.f32.mrf.mxu3  ;;  %v745_v36 = vpop.f32.mrf.mxu2 }
 0x87e   :  { %v708_v48 = vadd.f32 %v707_v35, %v689_v39  ;;  %v746_v49 = vadd.f32 %v745_v36, %v727_v40  ;;  %v760_v51 = vadd.f32 %v759_v43, %v758_v37  ;;  %v767_v52 = vadd.f32 %v766_v44, %v765_v38  ;;  %v1800_v35 = vld [vmem:[%s2520_s8 + $0x40] sm:$0xff]  ;;  %v1823_v36 = vld [vmem:[%s2520_s8 + $0xf8] sm:$0xff]  ;;  %v1822_v38 = vld [vmem:[%s2520_s8 + $0xf0] sm:$0xff] }
 0x87f   :  { %1339 = vmatpush.bf16.msrb.mxu1 %v1803_v29  ;;  %v1815_v37 = vld [vmem:[%s2520_s8 + $0xb8] sm:$0xff]  ;;  %1213 = vmatpush.bf16.msrb.mxu2 %v1823_v36  ;;  %v1821_v39 = vld [vmem:[%s2520_s8 + $0xe8] sm:$0xff] }
 0x880   :  { %v754_v58 = vmax.f32 %v708_v48, 0.0  ;;  %v755_v59 = vmax.f32 %v746_v49, 0.0  ;;  %v761_v62 = vrot.slane %v760_v51, 2  ;;  %v768_v15 = vrot.slane %v767_v52, 2  ;;  %1200 = vmatpush.bf16.msrb.mxu0 %v1815_v37  ;;  %v1813_v40 = vld [vmem:[%s2520_s8 + $0xa8] sm:$0xff]  ;;  %v1811_v48 = vld [vmem:[%s2520_s8 + $0x98] sm:$0xff] }
 0x881   :  { %v1818_v49 = vld [vmem:[%s2520_s8 + $0xd0] sm:$0xff] }
 0x882   :  { %v762_v57 = vadd.f32 %v761_v62, %v760_v51  ;;  %v769_v3 = vadd.f32 %v768_v15, %v767_v52  ;;  %v1809_v62 = vld [vmem:[%s2520_s8 + $0x88] sm:$0xff] }
 0x883   :  { %1340 = vmatpush.bf16.msrb.mxu1 %v1802_v31  ;;  %1214 = vmatpush.bf16.msrb.mxu2 %v1822_v38 }
 0x884   :  { %v763_v11 = vrot.slane %v762_v57, 1  ;;  %v770_v12 = vrot.slane %v769_v3, 1  ;;  %1201 = vmatpush.bf16.msrb.mxu0 %v1814_v63 }
 0x885   :  { %v709_v50 = vpop.f32.mrf.mxu3  ;;  %v747_v4 = vpop.f32.mrf.mxu2 }
 0x886   :  { %v710_v53 = vadd.f32 %v709_v50, %v691_v46  ;;  %v748_v54 = vadd.f32 %v747_v4, %v729_v47  ;;  %v764_v19 = vadd.f32 %v763_v11, %v762_v57  ;;  %v771_v21 = vadd.f32 %v770_v12, %v769_v3  ;;  %v1819_v47 = vld [vmem:[%s2520_s8 + $0xd8] sm:$0xff]  ;;  %v1810_v50 = vld [vmem:[%s2520_s8 + $0x90] sm:$0xff] }
 0x887   :  { %1341 = vmatpush.bf16.msrb.mxu1 %v1801_v33  ;;  %1215 = vmatpush.bf16.msrb.mxu2 %v1821_v39  ;;  %v1368_v4 = vld [vmem:[%s2521_s9 + $0x13] ss:$8 sm:$0x3] }
 0x888   :  { %v756_v60 = vmax.f32 %v710_v53, 0.0  ;;  %v757_v61 = vmax.f32 %v748_v54, 0.0  ;;  %1202 = vmatpush.bf16.msrb.mxu0 %v1813_v40  ;;  %v465_v51 = vperm.slane %v1368_v4, 0  ;;  %v466_v52 = vperm.slane %v1368_v4, 1  ;;  %v1817_v53 = vld [vmem:[%s2520_s8 + $0xc8] sm:$0xff] }
 0x88a   :  { %v772_v0 = vadd.f32 %v756_v60, %v754_v58  ;;  %v779_v1 = vadd.f32 %v757_v61, %v755_v59  ;;  %v502_v54 = vadd.f32 %v2268_v7, %v465_v51  ;;  %v515_v58 = vadd.f32 %v2270_v8, %v466_v52  ;;  %v1816_v61 = vld [vmem:[%s2520_s8 + $0xc0] sm:$0xff]  ;;  %v1369_v8 = vld [vmem:[%s2521_s9 + $0x14] ss:$8 sm:$0x3] }
 0x88b   :  { %1342 = vmatpush.bf16.msrb.mxu1 %v1800_v35  ;;  %1216 = vmatpush.bf16.msrb.mxu2 %v1820_v41  ;;  %v1808_v7 = vld [vmem:[%s2520_s8 + $0x80] sm:$0xff]  ;;  %v994_v15 = vperm.slane %v1369_v8, 1 }
 0x88c   :  { %v773_v56 = vrot.slane %v772_v0, 4  ;;  %v780_v2 = vrot.slane %v779_v1, 4  ;;  %1203 = vmatpush.bf16.msrb.mxu0 %v1812_v42  ;;  %v1036_v59 = vpack.c.bf16 %v502_v54, %v502_v54  ;;  %v1037_v60 = vpack.c.bf16 %v515_v58, %v515_v58 }
 0x88e   :  { %v774_v5 = vadd.f32 %v773_v56, %v772_v0  ;;  %v781_v6 = vadd.f32 %v780_v2, %v779_v1  ;;  %v993_v2 = vperm.slane %v1369_v8, 0 }
 0x88f   :  { %1217 = vmatpush.bf16.msrb.mxu2 %v1819_v47 }
 0x890   :  { %v775_v9 = vrot.slane %v774_v5, 2  ;;  %v782_v10 = vrot.slane %v781_v6, 2  ;;  %1204 = vmatpush.bf16.msrb.mxu0 %v1811_v48 }
 0x892   :  { %v776_v13 = vadd.f32 %v775_v9, %v774_v5  ;;  %v783_v14 = vadd.f32 %v782_v10, %v781_v6 }
 0x893   :  { %1218 = vmatpush.bf16.msrb.mxu2 %v1818_v49 }
 0x894   :  { %v777_v17 = vrot.slane %v776_v13, 1  ;;  %v784_v18 = vrot.slane %v783_v14, 1  ;;  %1205 = vmatpush.bf16.msrb.mxu0 %v1810_v50 }
 0x896   :  { %v778_v20 = vadd.f32 %v777_v17, %v776_v13  ;;  %v785_v22 = vadd.f32 %v784_v18, %v783_v14 }
 0x897   :  { %1219 = vmatpush.bf16.msrb.mxu2 %v1817_v53 }
 0x898   :  { %v786_v55 = vsel %vm199_vm4, %v764_v19, %v778_v20  ;;  %v787_v24 = vsel %vm199_vm4, %v771_v21, %v785_v22  ;;  %1206 = vmatpush.bf16.msrb.mxu0 %v1809_v62  ;;  %v53_v20 = vld [vmem:[%s2521_s9 + $0x15] ss:$0 sm:$0xff]  ;;  %vm1349_vm4 = vcmask 58368  }
 0x899   :  { %965 = vmatmul.f32.vlgmr.msra.gmra.mxu3 %v786_v55  ;;  %985 = vmatmul.f32.vlgmr.msra.gmra.mxu2 %v787_v24 }
 0x89a   :  { %1322 = vmatpush.bf16.msra.mxu3 %v1799_v23 }
 0x89b   :  { %1220 = vmatpush.bf16.msrb.mxu2 %v1816_v61 }
 0x89c   :  { %1207 = vmatpush.bf16.msrb.mxu0 %v1808_v7 }
 0x89e   :  { %1323 = vmatpush.bf16.msra.mxu3 %v1798_v25 }
 0x8a2   :  { %1324 = vmatpush.bf16.msra.mxu3 %v1797_v26 }
 0x8a6   :  { %1325 = vmatpush.bf16.msra.mxu3 %v1796_v27 }
 0x8aa   :  { %1326 = vmatpush.bf16.msra.mxu3 %v1795_v16 }
 0x8ae   :  { %1327 = vmatpush.bf16.msra.mxu3 %v1794_v30 }
 0x8b2   :  { %1328 = vmatpush.bf16.msra.mxu3 %v1793_v32 }
 0x8b6   :  { %1329 = vmatpush.bf16.msra.mxu3 %v1792_v34 }
 0x91c   :  { %v966_v43 = vpop.f32.mrf.mxu3  ;;  %v986_v44 = vpop.f32.mrf.mxu2 }
 0x91d   :  { %v987_v45 = vadd.f32 %v986_v44, %v966_v43 }
 0x91f   :  { %v989_v46 = vpack.c.bf16 %v987_v45, %v987_v45 }
 0x921   :  { %1620 = vmatmul.msk.bf16.vlgmr.msrb.gmra.mxu3 %vm262_vm6, %v989_v46  ;;  %1621 = vmatmul.msk.bf16.vlgmr.msra.gmra.mxu1 %vm262_vm6, %v989_v46 }
 0x931   :  { %1330 = vmatmul.bf16.vlgmr.msra.gmra.mxu3 %v1036_v59  ;;  %1343 = vmatmul.bf16.vlgmr.msrb.gmra.mxu1 %v1037_v60 }
 0x99e   :  { %v1032_v0 = vpop.f32.mrf.mxu1 }
 0x99f   :  { %v1033_v1 = vadd.f32 %v1032_v0, %v994_v15 }
 0x9a1   :  { %v1071_v56 = vpack.c.bf16 %v1033_v1, %v1033_v1 }
 0x9a3   :  { %1221 = vmatmul.bf16.vlgmr.msrb.gmra.mxu2 %v1071_v56 }
 0x9a4   :  { %v1019_v57 = vpop.f32.mrf.mxu3 }
 0x9a5   :  { %v1020_v3 = vadd.f32 %v1019_v57, %v993_v2 }
 0x9a6   :  { %v1034_v5 = vpop.f32.mrf.mxu1 }
 0x9a7   :  { %v1070_v6 = vpack.c.bf16 %v1020_v3, %v1020_v3 }
 0x9a9   :  { %1208 = vmatmul.bf16.vlgmr.msrb.gmra.mxu0 %v1070_v6 }
 0x9ac   :  { %v1021_v9 = vpop.f32.mrf.mxu3 }
 0x9ae   :  { %v1344_v10 = vpop.f32.mrf.mxu1 }
 0x9b4   :  { %v1331_v11 = vpop.f32.mrf.mxu3 }
 0x9b6   :  { %v1346_v12 = vpop.f32.mrf.mxu1 }
 0x9bc   :  { %v1333_v13 = vpop.f32.mrf.mxu3 }
 0xa26   :  { %v1209_v14 = vpop.f32.mrf.mxu0  ;;  %v1222_v17 = vpop.f32.mrf.mxu2 }
 0xa27   :  { %v1223_v18 = vadd.f32 %v1222_v17, %v1209_v14 }
 0xa29   :  { %v1332_v19 = vadd.f32 %v1331_v11, %v1223_v18 }
 0xa2b   :  { %v1345_v21 = vadd.f32 %v1344_v10, %v1332_v19 }
 0xa2d   :  { %v1348_v22 = vadd.f32 %v1345_v21, %v53_v20 }
 0xa2e   :  { %v1211_v23 = vpop.f32.mrf.mxu0  ;;  %v1224_v55 = vpop.f32.mrf.mxu2 }
 0xa2f   :  { %1350 = vst.msk [vmem:[#allocation2] sm:$0x3] %vm1349_vm4, %v1348_v22 }
 0xa30   :  { %1361 = dma.vmem_to_hbm [thread:$0]  %s1357_s23, 32, %s1359_s26, [#allocation3]  }
 0xa31   :  { %1874 = dma.done.wait [#allocation3], 32  }
 0xa32   :  { %1875 = vsyncadd [#allocation3], 4294967264 }
 0xa33   :  { %1366 = vsyncpa [#allocation3], 1 }

</bundles_post_ra>
